<compile_context>
chip_gen: v5e
topology: v5e:2x2
jax: 0.10.0
libtpu: 0.0.40
codegen_flags: <defaults>
</compile_context>

<pallas_src>
import functools
import math

import jax
import jax.numpy as jnp
from jax import lax
from jax.experimental import pallas as pl
from jax.experimental.pallas import tpu as pltpu

_VMEM_LIMIT = 32 * 1024 * 1024  # explicit scoped-VMEM budget (safe on v5e/v6e/v7x)


def _pick_tile(dim, candidates):
    """Largest MXU-aligned candidate that exactly divides `dim`, else full dim.

    Full-extent blocks are always legal w.r.t. the (8, 128) constraint, which
    keeps the toy shapes below working while large shapes get 128/256-aligned
    tiles (128-aligned is what v5e wants, 256-aligned fills the v6e/v7x MXU).
    """
    for c in candidates:
        if dim % c == 0:
            return c
    return dim


# ---------------------------------------------------------------------------
# Tiled linear kernels (MXU matmul + bias, K-reduction accumulator in VMEM)
# ---------------------------------------------------------------------------
def _matmul_kernel(x_ref, w_ref, b_ref, o_ref, acc_ref, *, compute_dtype):
    kk = pl.program_id(2)

    @pl.when(kk == 0)
    def _init():
        acc_ref[...] = jnp.zeros_like(acc_ref)

    acc_ref[...] += jnp.dot(
        x_ref[...].astype(compute_dtype),
        w_ref[...].astype(compute_dtype),
        preferred_element_type=jnp.float32,
    )

    @pl.when(kk == pl.num_programs(2) - 1)
    def _finalize():
        o_ref[...] = (acc_ref[...] + b_ref[...].astype(jnp.float32)).astype(o_ref.dtype)


def _qkv_matmul_kernel(xq_ref, xk_ref, xv_ref, w_ref, b_ref,
                       q_out, k_out, v_out,
                       acc_q, acc_k, acc_v, *, compute_dtype):
    """Fused q/k/v projections sharing one (M, N, K) pipeline."""
    kk = pl.program_id(2)

    @pl.when(kk == 0)
    def _init():
        acc_q[...] = jnp.zeros_like(acc_q)
        acc_k[...] = jnp.zeros_like(acc_k)
        acc_v[...] = jnp.zeros_like(acc_v)

    acc_q[...] += jnp.dot(xq_ref[...].astype(compute_dtype),
                          w_ref[0].astype(compute_dtype),
                          preferred_element_type=jnp.float32)
    acc_k[...] += jnp.dot(xk_ref[...].astype(compute_dtype),
                          w_ref[1].astype(compute_dtype),
                          preferred_element_type=jnp.float32)
    acc_v[...] += jnp.dot(xv_ref[...].astype(compute_dtype),
                          w_ref[2].astype(compute_dtype),
                          preferred_element_type=jnp.float32)

    @pl.when(kk == pl.num_programs(2) - 1)
    def _finalize():
        q_out[...] = (acc_q[...] + b_ref[0].astype(jnp.float32)).astype(q_out.dtype)
        k_out[...] = (acc_k[...] + b_ref[1].astype(jnp.float32)).astype(k_out.dtype)
        v_out[...] = (acc_v[...] + b_ref[2].astype(jnp.float32)).astype(v_out.dtype)


def pallas_linear(x, w, b, *, compute_dtype=jnp.float32):
    """y = x @ w + b.  x: (M, K), w: (K, N), b: (1, N)."""
    M, K = x.shape
    N = w.shape[-1]
    tm = _pick_tile(M, (256, 128))
    tn = _pick_tile(N, (256, 128))
    tk = _pick_tile(K, (512, 256, 128))
    grid = (M // tm, N // tn, K // tk)
    return pl.pallas_call(
        functools.partial(_matmul_kernel, compute_dtype=compute_dtype),
        out_shape=jax.ShapeDtypeStruct((M, N), jnp.float32),
        grid_spec=pltpu.PrefetchScalarGridSpec(
            num_scalar_prefetch=0,
            grid=grid,
            in_specs=[
                pl.BlockSpec((tm, tk), lambda i, j, kk: (i, kk)),
                pl.BlockSpec((tk, tn), lambda i, j, kk: (kk, j)),
                pl.BlockSpec((1, tn), lambda i, j, kk: (0, j)),
            ],
            out_specs=pl.BlockSpec((tm, tn), lambda i, j, kk: (i, j)),
            scratch_shapes=[pltpu.VMEM((tm, tn), jnp.float32)],
        ),
        compiler_params=pltpu.CompilerParams(
            dimension_semantics=("parallel", "parallel", "arbitrary"),
            vmem_limit_bytes=_VMEM_LIMIT,
        ),
    )(x, w, b)


def pallas_qkv_projection(xq, xk, xv, w3, b3, *, compute_dtype=jnp.float32):
    """Fused q/k/v projections in one pallas_call.

    xq/xk/xv: (M, D); w3: (3, D, D) stacked [wq, wk, wv]; b3: (3, 1, D).
    Returns (q, k, v), each (M, D) f32, heads packed in the last dim.
    """
    M, K = xq.shape
    N = w3.shape[-1]
    tm = _pick_tile(M, (256, 128))
    tn = _pick_tile(N, (256, 128))
    tk = _pick_tile(K, (512, 256, 128))
    grid = (M // tm, N // tn, K // tk)

    out = jax.ShapeDtypeStruct((M, N), jnp.float32)
    x_spec = pl.BlockSpec((tm, tk), lambda i, j, kk: (i, kk))
    o_spec = pl.BlockSpec((tm, tn), lambda i, j, kk: (i, j))

    return pl.pallas_call(
        functools.partial(_qkv_matmul_kernel, compute_dtype=compute_dtype),
        out_shape=(out, out, out),
        grid_spec=pltpu.PrefetchScalarGridSpec(
            num_scalar_prefetch=0,
            grid=grid,
            in_specs=[
                x_spec, x_spec, x_spec,
                pl.BlockSpec((3, tk, tn), lambda i, j, kk: (0, kk, j)),
                pl.BlockSpec((3, 1, tn), lambda i, j, kk: (0, 0, j)),
            ],
            out_specs=(o_spec, o_spec, o_spec),
            scratch_shapes=[
                pltpu.VMEM((tm, tn), jnp.float32),
                pltpu.VMEM((tm, tn), jnp.float32),
                pltpu.VMEM((tm, tn), jnp.float32),
            ],
        ),
        compiler_params=pltpu.CompilerParams(
            dimension_semantics=("parallel", "parallel", "arbitrary"),
            vmem_limit_bytes=_VMEM_LIMIT,
        ),
    )(xq, xk, xv, w3, b3)


# ---------------------------------------------------------------------------
# Flash-style multi-head attention on head-packed (B, S, D) activations
# ---------------------------------------------------------------------------
def _attention_kernel(q_ref, k_ref, v_ref, o_ref, m_sc, l_sc, acc_sc, *,
                      num_heads, d_k, scale, compute_dtype):
    ki = pl.program_id(2)

    @pl.when(ki == 0)
    def _init():
        m_sc[...] = jnp.full_like(m_sc, -jnp.inf)
        l_sc[...] = jnp.zeros_like(l_sc)
        acc_sc[...] = jnp.zeros_like(acc_sc)

    # All heads of this (q_tile, kv_tile) pair handled in one grid step.
    # num_heads is small and static -> unrolled loop over lane slices.
    for h in range(num_heads):
        sl = slice(h * d_k, (h + 1) * d_k)
        # Fold the 1/sqrt(d_k) scale into q: O(tq*d_k) instead of O(tq*tkv).
        qh = (q_ref[:, sl] * scale).astype(compute_dtype)            # (tq, d_k)
        kh = k_ref[:, sl].astype(compute_dtype)                      # (tkv, d_k)
        vh = v_ref[:, sl].astype(compute_dtype)                      # (tkv, d_k)

        # q @ k^T without materializing a transpose: contract the last dims.
        s = lax.dot_general(qh, kh, (((1,), (1,)), ((), ())),
                            preferred_element_type=jnp.float32)      # (tq, tkv)
        # TODO(synk): optional attention mask would be applied to `s` here.

        m_prev = m_sc[h]                                             # (tq, 1)
        m_new = jnp.maximum(m_prev, jnp.max(s, axis=-1, keepdims=True))
        alpha = jnp.exp(m_prev - m_new)
        p = jnp.exp(s - m_new)
        l_sc[h] = alpha * l_sc[h] + jnp.sum(p, axis=-1, keepdims=True)
        acc_sc[:, sl] = alpha * acc_sc[:, sl] + jnp.dot(
            p.astype(compute_dtype), vh, preferred_element_type=jnp.float32)
        m_sc[h] = m_new

    @pl.when(ki == pl.num_programs(2) - 1)
    def _finalize():
        for h in range(num_heads):
            sl = slice(h * d_k, (h + 1) * d_k)
            inv = pl.reciprocal(l_sc[h], approx=True)                # EUP slot
            o_ref[:, sl] = (acc_sc[:, sl] * inv).astype(o_ref.dtype)


def pallas_attention(qh, kh, vh, num_heads, *, compute_dtype=jnp.float32):
    """softmax(q k^T / sqrt(d_k)) v per head; inputs/outputs are (B, S, D)."""
    B, S, D = qh.shape
    d_k = D // num_heads
    tq = _pick_tile(S, (256, 128))
    tkv = _pick_tile(S, (512, 256, 128))
    grid = (B, S // tq, S // tkv)
    scale = 1.0 / math.sqrt(d_k)

    cost = pl.CostEstimate(
        flops=4 * B * S * S * D,                 # q k^T and p v
        transcendentals=B * num_heads * S * S,   # exp
        bytes_accessed=4 * 4 * B * S * D,        # q, k, v read + out write (f32)
    )

    q_spec = pl.BlockSpec((None, tq, D), lambda b, qi, ki: (b, qi, 0))
    kv_spec = pl.BlockSpec((None, tkv, D), lambda b, qi, ki: (b, ki, 0))

    return pl.pallas_call(
        functools.partial(_attention_kernel, num_heads=num_heads, d_k=d_k,
                          scale=scale, compute_dtype=compute_dtype),
        out_shape=jax.ShapeDtypeStruct((B, S, D), jnp.float32),
        grid_spec=pltpu.PrefetchScalarGridSpec(
            num_scalar_prefetch=0,
            grid=grid,
            in_specs=[q_spec, kv_spec, kv_spec],
            out_specs=pl.BlockSpec((None, tq, D), lambda b, qi, ki: (b, qi, 0)),
            scratch_shapes=[
                pltpu.VMEM((num_heads, tq, 1), jnp.float32),   # running max
                pltpu.VMEM((num_heads, tq, 1), jnp.float32),   # running sum
                pltpu.VMEM((tq, D), jnp.float32),              # output accumulator
            ],
        ),
        compiler_params=pltpu.CompilerParams(
            dimension_semantics=("parallel", "parallel", "arbitrary"),
            vmem_limit_bytes=_VMEM_LIMIT,
        ),
        cost_estimate=cost,
    )(qh, kh, vh)


# ---------------------------------------------------------------------------
# Module wrapper
# ---------------------------------------------------------------------------
def multi_head_attention(q, k, v, params, num_heads,
                         compute_dtype=jnp.float32, mask=None):
    assert mask is None  # TODO(synk): mask not wired in (torch default path).
    B, S, D = q.shape

    # Fused q/k/v projections; outputs stay head-packed in (B, S, D) layout,
    # so there are no transpose(0, 2, 1, 3) HBM shuffles anywhere.
    qh, kh, vh = pallas_qkv_projection(
        q.reshape(B * S, D), k.reshape(B * S, D), v.reshape(B * S, D),
        params["w_qkv"], params["b_qkv"], compute_dtype=compute_dtype)

    ctx = pallas_attention(qh.reshape(B, S, D), kh.reshape(B, S, D),
                           vh.reshape(B, S, D), num_heads,
                           compute_dtype=compute_dtype)                 # (B, S, D)

    out = pallas_linear(ctx.reshape(B * S, D), params["wo"],
                        params["bo"].reshape(1, D), compute_dtype=compute_dtype)
    return out.reshape(B, S, D)


def init_params(key, d_model):
    """torch.nn.Linear-style init; weights stored as (in, out) so y = x @ W + b.

    The three projection Linears are stored stacked: w_qkv = (3, D, D) with
    [wq, wk, wv] and b_qkv = (3, 1, D) — same parameters, fused layout.
    """
    keys = jax.random.split(key, 8)
    bound = 1.0 / math.sqrt(d_model)

    def u(kk, shape):
        return jax.random.uniform(kk, shape, jnp.float32, -bound, bound)

    wq, wk, wv = (u(keys[0], (d_model, d_model)),
                  u(keys[2], (d_model, d_model)),
                  u(keys[4], (d_model, d_model)))
    bq, bk, bv = u(keys[1], (d_model,)), u(keys[3], (d_model,)), u(keys[5], (d_model,))
    return {
        "w_qkv": jnp.stack([wq, wk, wv]),               # (3, D, D)
        "b_qkv": jnp.stack([bq, bk, bv])[:, None, :],   # (3, 1, D)
        "wo": u(keys[6], (d_model, d_model)),
        "bo": u(keys[7], (d_model,)),
    }


# ---------------------------------------------------------------------------
# Pure-JAX reference (mirrors the torch forward) for correctness checks
# ---------------------------------------------------------------------------
def reference_mha(q, k, v, params, num_heads):
    B, S, D = q.shape
    d_k = D // num_heads

    def proj(x, w, b):
        y = x.reshape(B * S, D) @ w + b.reshape(-1)
        return y.reshape(B, S, num_heads, d_k).transpose(0, 2, 1, 3)

    qh = proj(q, params["w_qkv"][0], params["b_qkv"][0])
    kh = proj(k, params["w_qkv"][1], params["b_qkv"][1])
    vh = proj(v, params["w_qkv"][2], params["b_qkv"][2])
    scores = jnp.einsum("bhqd,bhkd->bhqk", qh, kh) / math.sqrt(d_k)
    attn = jax.nn.softmax(scores, axis=-1)
    ctx = jnp.einsum("bhqk,bhkd->bhqd", attn, vh)
    ctx = ctx.transpose(0, 2, 1, 3).reshape(B * S, D)
    return (ctx @ params["wo"] + params["bo"]).reshape(B, S, D)


if __name__ == "__main__":
    batch, seq, d_model, num_heads = 2, 8, 32, 4

    key = jax.random.PRNGKey(0)
    k_q, k_k, k_v, k_p = jax.random.split(key, 4)
    q = jax.random.normal(k_q, (batch, seq, d_model), jnp.float32)
    k = jax.random.normal(k_k, (batch, seq, d_model), jnp.float32)
    v = jax.random.normal(k_v, (batch, seq, d_model), jnp.float32)
    params = init_params(k_p, d_model)

    ref = reference_mha(q, k, v, params, num_heads)

    # f32 MXU path (tight tolerance; only the approx reciprocal differs).
    mha_f32 = jax.jit(functools.partial(multi_head_attention, num_heads=num_heads))
    out = jax.block_until_ready(mha_f32(q, k, v, params))
    assert out.shape == (batch, seq, d_model)
    assert jnp.allclose(out, ref, atol=5e-3, rtol=5e-3), "f32 mismatch vs reference"

    # bf16-input / f32-accumulate path (production default on v6e/v7x).
    mha_bf16 = jax.jit(functools.partial(multi_head_attention, num_heads=num_heads,
                                         compute_dtype=jnp.bfloat16))
    out_bf16 = jax.block_until_ready(mha_bf16(q, k, v, params))
    assert jnp.allclose(out_bf16, ref, atol=5e-2, rtol=5e-2), "bf16 mismatch vs reference"

    print("KERNEL_OK")
</pallas_src>

<mosaic_0001>
module attributes {stable_mosaic.version = 11 : i64} {
  func.func @_qkv_matmul_kernel(%arg0: i32, %arg1: i32, %arg2: i32, %arg3: memref<16x32xf32, #tpu.memory_space<vmem>>, %arg4: memref<16x32xf32, #tpu.memory_space<vmem>>, %arg5: memref<16x32xf32, #tpu.memory_space<vmem>>, %arg6: memref<3x32x32xf32, #tpu.memory_space<vmem>>, %arg7: memref<3x1x32xf32, #tpu.memory_space<vmem>>, %arg8: memref<16x32xf32, #tpu.memory_space<vmem>>, %arg9: memref<16x32xf32, #tpu.memory_space<vmem>>, %arg10: memref<16x32xf32, #tpu.memory_space<vmem>>, %arg11: memref<16x32xf32, #tpu.memory_space<vmem>>, %arg12: memref<16x32xf32, #tpu.memory_space<vmem>>, %arg13: memref<16x32xf32, #tpu.memory_space<vmem>>) attributes {dimension_semantics = [#tpu.dimension_semantics<parallel>, #tpu.dimension_semantics<parallel>, #tpu.dimension_semantics<arbitrary>], iteration_bounds = array<i64: 1, 1, 1>, scalar_prefetch = 0 : i64, scratch_operands = 3 : i64, tpu.core_type = #tpu.core_type<tc>, window_params = [{transform_indices = @transform_0, window_bounds = array<i64: 16, 32>}, {transform_indices = @transform_1, window_bounds = array<i64: 16, 32>}, {transform_indices = @transform_2, window_bounds = array<i64: 16, 32>}, {transform_indices = @transform_3, window_bounds = array<i64: 3, 32, 32>}, {transform_indices = @transform_4, window_bounds = array<i64: 3, 1, 32>}, {transform_indices = @transform_5, window_bounds = array<i64: 16, 32>}, {transform_indices = @transform_6, window_bounds = array<i64: 16, 32>}, {transform_indices = @transform_7, window_bounds = array<i64: 16, 32>}]} {
    %c0_i32 = arith.constant 0 : i32
    %0 = arith.cmpi eq, %arg2, %c0_i32 : i32
    %1 = arith.extui %0 : i1 to i32
    %c0_i32_0 = arith.constant 0 : i32
    %2 = arith.cmpi ne, %1, %c0_i32_0 : i32
    scf.if %2 {
      %cst_29 = arith.constant 0.000000e+00 : f32
      %27 = vector.broadcast %cst_29 : f32 to vector<16x32xf32>
      %c0_30 = arith.constant 0 : index
      %c0_31 = arith.constant 0 : index
      %28 = vector.load %arg11[%c0_30, %c0_31] : memref<16x32xf32, #tpu.memory_space<vmem>>, vector<16x32xf32>
      tpu.vector_store %arg11[%c0_30, %c0_31], %27 {strides = array<i32>} : memref<16x32xf32, #tpu.memory_space<vmem>>, vector<16x32xf32>,
      %cst_32 = arith.constant 0.000000e+00 : f32
      %29 = vector.broadcast %cst_32 : f32 to vector<16x32xf32>
      %c0_33 = arith.constant 0 : index
      %c0_34 = arith.constant 0 : index
      %30 = vector.load %arg12[%c0_33, %c0_34] : memref<16x32xf32, #tpu.memory_space<vmem>>, vector<16x32xf32>
      tpu.vector_store %arg12[%c0_33, %c0_34], %29 {strides = array<i32>} : memref<16x32xf32, #tpu.memory_space<vmem>>, vector<16x32xf32>,
      %cst_35 = arith.constant 0.000000e+00 : f32
      %31 = vector.broadcast %cst_35 : f32 to vector<16x32xf32>
      %c0_36 = arith.constant 0 : index
      %c0_37 = arith.constant 0 : index
      %32 = vector.load %arg13[%c0_36, %c0_37] : memref<16x32xf32, #tpu.memory_space<vmem>>, vector<16x32xf32>
      tpu.vector_store %arg13[%c0_36, %c0_37], %31 {strides = array<i32>} : memref<16x32xf32, #tpu.memory_space<vmem>>, vector<16x32xf32>,
    } else {
    }
    %c0 = arith.constant 0 : index
    %c0_1 = arith.constant 0 : index
    %3 = vector.load %arg11[%c0, %c0_1] : memref<16x32xf32, #tpu.memory_space<vmem>>, vector<16x32xf32>
    %c0_2 = arith.constant 0 : index
    %c0_3 = arith.constant 0 : index
    %4 = vector.load %arg3[%c0_2, %c0_3] : memref<16x32xf32, #tpu.memory_space<vmem>>, vector<16x32xf32>
    %c0_4 = arith.constant 0 : index
    %c0_5 = arith.constant 0 : index
    %c0_6 = arith.constant 0 : index
    %5 = vector.load %arg6[%c0_4, %c0_5, %c0_6] : memref<3x32x32xf32, #tpu.memory_space<vmem>>, vector<1x32x32xf32>
    %6 = vector.shape_cast %5 : vector<1x32x32xf32> to vector<32x32xf32>
    %cst = arith.constant dense<0.000000e+00> : vector<16x32xf32>
    %7 = tpu.matmul %4, %6, %cst {dimension_numbers = #tpu.dot_dimension_numbers<[1], [0], [0], [1], [0, 0, 1, 1], [], []>} : vector<16x32xf32>, vector<32x32xf32>, vector<16x32xf32> -> vector<16x32xf32>
    %8 = arith.addf %3, %7 : vector<16x32xf32>
    %c0_7 = arith.constant 0 : index
    %c0_8 = arith.constant 0 : index
    %9 = vector.load %arg11[%c0_7, %c0_8] : memref<16x32xf32, #tpu.memory_space<vmem>>, vector<16x32xf32>
    tpu.vector_store %arg11[%c0_7, %c0_8], %8 {strides = array<i32>} : memref<16x32xf32, #tpu.memory_space<vmem>>, vector<16x32xf32>,
    %c0_9 = arith.constant 0 : index
    %c0_10 = arith.constant 0 : index
    %10 = vector.load %arg12[%c0_9, %c0_10] : memref<16x32xf32, #tpu.memory_space<vmem>>, vector<16x32xf32>
    %c0_11 = arith.constant 0 : index
    %c0_12 = arith.constant 0 : index
    %11 = vector.load %arg4[%c0_11, %c0_12] : memref<16x32xf32, #tpu.memory_space<vmem>>, vector<16x32xf32>
    %c1 = arith.constant 1 : index
    %c0_13 = arith.constant 0 : index
    %c0_14 = arith.constant 0 : index
    %12 = vector.load %arg6[%c1, %c0_13, %c0_14] : memref<3x32x32xf32, #tpu.memory_space<vmem>>, vector<1x32x32xf32>
    %13 = vector.shape_cast %12 : vector<1x32x32xf32> to vector<32x32xf32>
    %cst_15 = arith.constant dense<0.000000e+00> : vector<16x32xf32>
    %14 = tpu.matmul %11, %13, %cst_15 {dimension_numbers = #tpu.dot_dimension_numbers<[1], [0], [0], [1], [0, 0, 1, 1], [], []>} : vector<16x32xf32>, vector<32x32xf32>, vector<16x32xf32> -> vector<16x32xf32>
    %15 = arith.addf %10, %14 : vector<16x32xf32>
    %c0_16 = arith.constant 0 : index
    %c0_17 = arith.constant 0 : index
    %16 = vector.load %arg12[%c0_16, %c0_17] : memref<16x32xf32, #tpu.memory_space<vmem>>, vector<16x32xf32>
    tpu.vector_store %arg12[%c0_16, %c0_17], %15 {strides = array<i32>} : memref<16x32xf32, #tpu.memory_space<vmem>>, vector<16x32xf32>,
    %c0_18 = arith.constant 0 : index
    %c0_19 = arith.constant 0 : index
    %17 = vector.load %arg13[%c0_18, %c0_19] : memref<16x32xf32, #tpu.memory_space<vmem>>, vector<16x32xf32>
    %c0_20 = arith.constant 0 : index
    %c0_21 = arith.constant 0 : index
    %18 = vector.load %arg5[%c0_20, %c0_21] : memref<16x32xf32, #tpu.memory_space<vmem>>, vector<16x32xf32>
    %c2 = arith.constant 2 : index
    %c0_22 = arith.constant 0 : index
    %c0_23 = arith.constant 0 : index
    %19 = vector.load %arg6[%c2, %c0_22, %c0_23] : memref<3x32x32xf32, #tpu.memory_space<vmem>>, vector<1x32x32xf32>
    %20 = vector.shape_cast %19 : vector<1x32x32xf32> to vector<32x32xf32>
    %cst_24 = arith.constant dense<0.000000e+00> : vector<16x32xf32>
    %21 = tpu.matmul %18, %20, %cst_24 {dimension_numbers = #tpu.dot_dimension_numbers<[1], [0], [0], [1], [0, 0, 1, 1], [], []>} : vector<16x32xf32>, vector<32x32xf32>, vector<16x32xf32> -> vector<16x32xf32>
    %22 = arith.addf %17, %21 : vector<16x32xf32>
    %c0_25 = arith.constant 0 : index
    %c0_26 = arith.constant 0 : index
    %23 = vector.load %arg13[%c0_25, %c0_26] : memref<16x32xf32, #tpu.memory_space<vmem>>, vector<16x32xf32>
    tpu.vector_store %arg13[%c0_25, %c0_26], %22 {strides = array<i32>} : memref<16x32xf32, #tpu.memory_space<vmem>>, vector<16x32xf32>,
    %c0_i32_27 = arith.constant 0 : i32
    %24 = arith.cmpi eq, %arg2, %c0_i32_27 : i32
    %25 = arith.extui %24 : i1 to i32
    %c0_i32_28 = arith.constant 0 : i32
    %26 = arith.cmpi ne, %25, %c0_i32_28 : i32
    scf.if %26 {
      %c0_29 = arith.constant 0 : index
      %c0_30 = arith.constant 0 : index
      %27 = vector.load %arg11[%c0_29, %c0_30] : memref<16x32xf32, #tpu.memory_space<vmem>>, vector<16x32xf32>
      %c0_31 = arith.constant 0 : index
      %c0_32 = arith.constant 0 : index
      %c0_33 = arith.constant 0 : index
      %28 = vector.load %arg7[%c0_31, %c0_32, %c0_33] : memref<3x1x32xf32, #tpu.memory_space<vmem>>, vector<1x1x32xf32>
      %29 = vector.shape_cast %28 : vector<1x1x32xf32> to vector<1x32xf32>
      %30 = vector.broadcast %29 : vector<1x32xf32> to vector<16x32xf32>
      %31 = arith.addf %27, %30 : vector<16x32xf32>
      %c0_34 = arith.constant 0 : index
      %c0_35 = arith.constant 0 : index
      %32 = vector.load %arg8[%c0_34, %c0_35] : memref<16x32xf32, #tpu.memory_space<vmem>>, vector<16x32xf32>
      tpu.vector_store %arg8[%c0_34, %c0_35], %31 {strides = array<i32>} : memref<16x32xf32, #tpu.memory_space<vmem>>, vector<16x32xf32>,
      %c0_36 = arith.constant 0 : index
      %c0_37 = arith.constant 0 : index
      %33 = vector.load %arg12[%c0_36, %c0_37] : memref<16x32xf32, #tpu.memory_space<vmem>>, vector<16x32xf32>
      %c1_38 = arith.constant 1 : index
      %c0_39 = arith.constant 0 : index
      %c0_40 = arith.constant 0 : index
      %34 = vector.load %arg7[%c1_38, %c0_39, %c0_40] : memref<3x1x32xf32, #tpu.memory_space<vmem>>, vector<1x1x32xf32>
      %35 = vector.shape_cast %34 : vector<1x1x32xf32> to vector<1x32xf32>
      %36 = vector.broadcast %35 : vector<1x32xf32> to vector<16x32xf32>
      %37 = arith.addf %33, %36 : vector<16x32xf32>
      %c0_41 = arith.constant 0 : index
      %c0_42 = arith.constant 0 : index
      %38 = vector.load %arg9[%c0_41, %c0_42] : memref<16x32xf32, #tpu.memory_space<vmem>>, vector<16x32xf32>
      tpu.vector_store %arg9[%c0_41, %c0_42], %37 {strides = array<i32>} : memref<16x32xf32, #tpu.memory_space<vmem>>, vector<16x32xf32>,
      %c0_43 = arith.constant 0 : index
      %c0_44 = arith.constant 0 : index
      %39 = vector.load %arg13[%c0_43, %c0_44] : memref<16x32xf32, #tpu.memory_space<vmem>>, vector<16x32xf32>
      %c2_45 = arith.constant 2 : index
      %c0_46 = arith.constant 0 : index
      %c0_47 = arith.constant 0 : index
      %40 = vector.load %arg7[%c2_45, %c0_46, %c0_47] : memref<3x1x32xf32, #tpu.memory_space<vmem>>, vector<1x1x32xf32>
      %41 = vector.shape_cast %40 : vector<1x1x32xf32> to vector<1x32xf32>
      %42 = vector.broadcast %41 : vector<1x32xf32> to vector<16x32xf32>
      %43 = arith.addf %39, %42 : vector<16x32xf32>
      %c0_48 = arith.constant 0 : index
      %c0_49 = arith.constant 0 : index
      %44 = vector.load %arg10[%c0_48, %c0_49] : memref<16x32xf32, #tpu.memory_space<vmem>>, vector<16x32xf32>
      tpu.vector_store %arg10[%c0_48, %c0_49], %43 {strides = array<i32>} : memref<16x32xf32, #tpu.memory_space<vmem>>, vector<16x32xf32>,
    } else {
    }
    return
  }
  func.func @transform_0(%arg0: i32, %arg1: i32, %arg2: i32) -> (i32, i32) {
    %c0_i32 = arith.constant 0 : i32
    return %arg0, %arg2 : i32, i32
  }
  func.func @transform_1(%arg0: i32, %arg1: i32, %arg2: i32) -> (i32, i32) {
    %c0_i32 = arith.constant 0 : i32
    return %arg0, %arg2 : i32, i32
  }
  func.func @transform_2(%arg0: i32, %arg1: i32, %arg2: i32) -> (i32, i32) {
    %c0_i32 = arith.constant 0 : i32
    return %arg0, %arg2 : i32, i32
  }
  func.func @transform_3(%arg0: i32, %arg1: i32, %arg2: i32) -> (i32, i32, i32) {
    %c0_i32 = arith.constant 0 : i32
    %c0_i32_0 = arith.constant 0 : i32
    return %c0_i32, %arg2, %arg1 : i32, i32, i32
  }
  func.func @transform_4(%arg0: i32, %arg1: i32, %arg2: i32) -> (i32, i32, i32) {
    %c0_i32 = arith.constant 0 : i32
    %c0_i32_0 = arith.constant 0 : i32
    %c0_i32_1 = arith.constant 0 : i32
    return %c0_i32, %c0_i32_0, %arg1 : i32, i32, i32
  }
  func.func @transform_5(%arg0: i32, %arg1: i32, %arg2: i32) -> (i32, i32) {
    %c0_i32 = arith.constant 0 : i32
    return %arg0, %arg1 : i32, i32
  }
  func.func @transform_6(%arg0: i32, %arg1: i32, %arg2: i32) -> (i32, i32) {
    %c0_i32 = arith.constant 0 : i32
    return %arg0, %arg1 : i32, i32
  }
  func.func @transform_7(%arg0: i32, %arg1: i32, %arg2: i32) -> (i32, i32) {
    %c0_i32 = arith.constant 0 : i32
    return %arg0, %arg1 : i32, i32
  }
}

module attributes {stable_mosaic.version = 11 : i64} {
  func.func @_attention_kernel(%arg0: i32, %arg1: i32, %arg2: i32, %arg3: memref<1x8x32xf32, #tpu.memory_space<vmem>>, %arg4: memref<1x8x32xf32, #tpu.memory_space<vmem>>, %arg5: memref<1x8x32xf32, #tpu.memory_space<vmem>>, %arg6: memref<1x8x32xf32, #tpu.memory_space<vmem>>, %arg7: memref<4x8x1xf32, #tpu.memory_space<vmem>>, %arg8: memref<4x8x1xf32, #tpu.memory_space<vmem>>, %arg9: memref<8x32xf32, #tpu.memory_space<vmem>>) attributes {dimension_semantics = [#tpu.dimension_semantics<parallel>, #tpu.dimension_semantics<parallel>, #tpu.dimension_semantics<arbitrary>], iteration_bounds = array<i64: 2, 1, 1>, scalar_prefetch = 0 : i64, scratch_operands = 3 : i64, tpu.core_type = #tpu.core_type<tc>, window_params = [{transform_indices = @transform_0, window_bounds = array<i64: 1, 8, 32>}, {transform_indices = @transform_1, window_bounds = array<i64: 1, 8, 32>}, {transform_indices = @transform_2, window_bounds = array<i64: 1, 8, 32>}, {transform_indices = @transform_3, window_bounds = array<i64: 1, 8, 32>}]} {
    %c0_i32 = arith.constant 0 : i32
    %0 = arith.cmpi eq, %arg2, %c0_i32 : i32
    %1 = arith.extui %0 : i1 to i32
    %c0_i32_0 = arith.constant 0 : i32
    %2 = arith.cmpi ne, %1, %c0_i32_0 : i32
    scf.if %2 {
      %cst_115 = arith.constant 0xFF800000 : f32
      %154 = vector.broadcast %cst_115 : f32 to vector<4x8x1xf32>
      %c0_116 = arith.constant 0 : index
      %c0_117 = arith.constant 0 : index
      %c0_118 = arith.constant 0 : index
      %155 = vector.load %arg7[%c0_116, %c0_117, %c0_118] : memref<4x8x1xf32, #tpu.memory_space<vmem>>, vector<4x8x1xf32>
      tpu.vector_store %arg7[%c0_116, %c0_117, %c0_118], %154 {strides = array<i32>} : memref<4x8x1xf32, #tpu.memory_space<vmem>>, vector<4x8x1xf32>,
      %cst_119 = arith.constant 0.000000e+00 : f32
      %156 = vector.broadcast %cst_119 : f32 to vector<4x8x1xf32>
      %c0_120 = arith.constant 0 : index
      %c0_121 = arith.constant 0 : index
      %c0_122 = arith.constant 0 : index
      %157 = vector.load %arg8[%c0_120, %c0_121, %c0_122] : memref<4x8x1xf32, #tpu.memory_space<vmem>>, vector<4x8x1xf32>
      tpu.vector_store %arg8[%c0_120, %c0_121, %c0_122], %156 {strides = array<i32>} : memref<4x8x1xf32, #tpu.memory_space<vmem>>, vector<4x8x1xf32>,
      %cst_123 = arith.constant 0.000000e+00 : f32
      %158 = vector.broadcast %cst_123 : f32 to vector<8x32xf32>
      %c0_124 = arith.constant 0 : index
      %c0_125 = arith.constant 0 : index
      %159 = vector.load %arg9[%c0_124, %c0_125] : memref<8x32xf32, #tpu.memory_space<vmem>>, vector<8x32xf32>
      tpu.vector_store %arg9[%c0_124, %c0_125], %158 {strides = array<i32>} : memref<8x32xf32, #tpu.memory_space<vmem>>, vector<8x32xf32>,
    } else {
    }
    %c0 = arith.constant 0 : index
    %c0_1 = arith.constant 0 : index
    %c0_2 = arith.constant 0 : index
    %3 = vector.load %arg3[%c0, %c0_1, %c0_2] : memref<1x8x32xf32, #tpu.memory_space<vmem>>, vector<1x8x8xf32>
    %4 = vector.shape_cast %3 : vector<1x8x8xf32> to vector<8x8xf32>
    %cst = arith.constant 0.353553385 : f32
    %5 = vector.broadcast %cst : f32 to vector<8x8xf32>
    %6 = arith.mulf %4, %5 : vector<8x8xf32>
    %c0_3 = arith.constant 0 : index
    %c0_4 = arith.constant 0 : index
    %c0_5 = arith.constant 0 : index
    %7 = vector.load %arg4[%c0_3, %c0_4, %c0_5] : memref<1x8x32xf32, #tpu.memory_space<vmem>>, vector<1x8x8xf32>
    %8 = vector.shape_cast %7 : vector<1x8x8xf32> to vector<8x8xf32>
    %c0_6 = arith.constant 0 : index
    %c0_7 = arith.constant 0 : index
    %c0_8 = arith.constant 0 : index
    %9 = vector.load %arg5[%c0_6, %c0_7, %c0_8] : memref<1x8x32xf32, #tpu.memory_space<vmem>>, vector<1x8x8xf32>
    %10 = vector.shape_cast %9 : vector<1x8x8xf32> to vector<8x8xf32>
    %cst_9 = arith.constant dense<0.000000e+00> : vector<8x8xf32>
    %11 = tpu.matmul %6, %8, %cst_9 {dimension_numbers = #tpu.dot_dimension_numbers<[1], [1], [0], [0], [0, 0, 1, 0], [], []>} : vector<8x8xf32>, vector<8x8xf32>, vector<8x8xf32> -> vector<8x8xf32>
    %c0_10 = arith.constant 0 : index
    %c0_11 = arith.constant 0 : index
    %c0_12 = arith.constant 0 : index
    %12 = vector.load %arg7[%c0_10, %c0_11, %c0_12] : memref<4x8x1xf32, #tpu.memory_space<vmem>>, vector<1x8x1xf32>
    %13 = vector.shape_cast %12 : vector<1x8x1xf32> to vector<8x1xf32>
    %cst_13 = arith.constant dense<0xFF800000> : vector<8xf32>
    %14 = vector.multi_reduction <maximumf>, %11, %cst_13 [1] : vector<8x8xf32> to vector<8xf32>
    %15 = vector.shape_cast %14 : vector<8xf32> to vector<8x1xf32>
    %16 = arith.maximumf %13, %15 : vector<8x1xf32>
    %17 = arith.subf %13, %16 : vector<8x1xf32>
    %18 = math.exp %17 : vector<8x1xf32>
    %19 = vector.broadcast %16 : vector<8x1xf32> to vector<8x8xf32>
    %20 = arith.subf %11, %19 : vector<8x8xf32>
    %21 = math.exp %20 : vector<8x8xf32>
    %c0_14 = arith.constant 0 : index
    %c0_15 = arith.constant 0 : index
    %c0_16 = arith.constant 0 : index
    %22 = vector.load %arg8[%c0_14, %c0_15, %c0_16] : memref<4x8x1xf32, #tpu.memory_space<vmem>>, vector<1x8x1xf32>
    %23 = vector.shape_cast %22 : vector<1x8x1xf32> to vector<8x1xf32>
    %24 = arith.mulf %18, %23 : vector<8x1xf32>
    %cst_17 = arith.constant dense<0.000000e+00> : vector<8xf32>
    %25 = vector.multi_reduction <add>, %21, %cst_17 [1] : vector<8x8xf32> to vector<8xf32>
    %26 = vector.shape_cast %25 : vector<8xf32> to vector<8x1xf32>
    %27 = arith.addf %24, %26 : vector<8x1xf32>
    %c0_18 = arith.constant 0 : index
    %c0_19 = arith.constant 0 : index
    %c0_20 = arith.constant 0 : index
    %28 = vector.load %arg8[%c0_18, %c0_19, %c0_20] : memref<4x8x1xf32, #tpu.memory_space<vmem>>, vector<1x8x1xf32>
    %29 = vector.shape_cast %28 : vector<1x8x1xf32> to vector<8x1xf32>
    %30 = vector.shape_cast %27 : vector<8x1xf32> to vector<1x8x1xf32>
    tpu.vector_store %arg8[%c0_18, %c0_19, %c0_20], %30 {strides = array<i32>} : memref<4x8x1xf32, #tpu.memory_space<vmem>>, vector<1x8x1xf32>,
    %c0_21 = arith.constant 0 : index
    %c0_22 = arith.constant 0 : index
    %31 = vector.load %arg9[%c0_21, %c0_22] : memref<8x32xf32, #tpu.memory_space<vmem>>, vector<8x8xf32>
    %32 = vector.broadcast %18 : vector<8x1xf32> to vector<8x8xf32>
    %33 = arith.mulf %32, %31 : vector<8x8xf32>
    %cst_23 = arith.constant dense<0.000000e+00> : vector<8x8xf32>
    %34 = tpu.matmul %21, %10, %cst_23 {dimension_numbers = #tpu.dot_dimension_numbers<[1], [0], [0], [1], [0, 0, 1, 1], [], []>} : vector<8x8xf32>, vector<8x8xf32>, vector<8x8xf32> -> vector<8x8xf32>
    %35 = arith.addf %33, %34 : vector<8x8xf32>
    %c0_24 = arith.constant 0 : index
    %c0_25 = arith.constant 0 : index
    %36 = vector.load %arg9[%c0_24, %c0_25] : memref<8x32xf32, #tpu.memory_space<vmem>>, vector<8x8xf32>
    tpu.vector_store %arg9[%c0_24, %c0_25], %35 {strides = array<i32>} : memref<8x32xf32, #tpu.memory_space<vmem>>, vector<8x8xf32>,
    %c0_26 = arith.constant 0 : index
    %c0_27 = arith.constant 0 : index
    %c0_28 = arith.constant 0 : index
    %37 = vector.load %arg7[%c0_26, %c0_27, %c0_28] : memref<4x8x1xf32, #tpu.memory_space<vmem>>, vector<1x8x1xf32>
    %38 = vector.shape_cast %37 : vector<1x8x1xf32> to vector<8x1xf32>
    %39 = vector.shape_cast %16 : vector<8x1xf32> to vector<1x8x1xf32>
    tpu.vector_store %arg7[%c0_26, %c0_27, %c0_28], %39 {strides = array<i32>} : memref<4x8x1xf32, #tpu.memory_space<vmem>>, vector<1x8x1xf32>,
    %c0_29 = arith.constant 0 : index
    %c0_30 = arith.constant 0 : index
    %c8 = arith.constant 8 : index
    %40 = vector.load %arg3[%c0_29, %c0_30, %c8] : memref<1x8x32xf32, #tpu.memory_space<vmem>>, vector<1x8x8xf32>
    %41 = vector.shape_cast %40 : vector<1x8x8xf32> to vector<8x8xf32>
    %cst_31 = arith.constant 0.353553385 : f32
    %42 = vector.broadcast %cst_31 : f32 to vector<8x8xf32>
    %43 = arith.mulf %41, %42 : vector<8x8xf32>
    %c0_32 = arith.constant 0 : index
    %c0_33 = arith.constant 0 : index
    %c8_34 = arith.constant 8 : index
    %44 = vector.load %arg4[%c0_32, %c0_33, %c8_34] : memref<1x8x32xf32, #tpu.memory_space<vmem>>, vector<1x8x8xf32>
    %45 = vector.shape_cast %44 : vector<1x8x8xf32> to vector<8x8xf32>
    %c0_35 = arith.constant 0 : index
    %c0_36 = arith.constant 0 : index
    %c8_37 = arith.constant 8 : index
    %46 = vector.load %arg5[%c0_35, %c0_36, %c8_37] : memref<1x8x32xf32, #tpu.memory_space<vmem>>, vector<1x8x8xf32>
    %47 = vector.shape_cast %46 : vector<1x8x8xf32> to vector<8x8xf32>
    %cst_38 = arith.constant dense<0.000000e+00> : vector<8x8xf32>
    %48 = tpu.matmul %43, %45, %cst_38 {dimension_numbers = #tpu.dot_dimension_numbers<[1], [1], [0], [0], [0, 0, 1, 0], [], []>} : vector<8x8xf32>, vector<8x8xf32>, vector<8x8xf32> -> vector<8x8xf32>
    %c1 = arith.constant 1 : index
    %c0_39 = arith.constant 0 : index
    %c0_40 = arith.constant 0 : index
    %49 = vector.load %arg7[%c1, %c0_39, %c0_40] : memref<4x8x1xf32, #tpu.memory_space<vmem>>, vector<1x8x1xf32>
    %50 = vector.shape_cast %49 : vector<1x8x1xf32> to vector<8x1xf32>
    %cst_41 = arith.constant dense<0xFF800000> : vector<8xf32>
    %51 = vector.multi_reduction <maximumf>, %48, %cst_41 [1] : vector<8x8xf32> to vector<8xf32>
    %52 = vector.shape_cast %51 : vector<8xf32> to vector<8x1xf32>
    %53 = arith.maximumf %50, %52 : vector<8x1xf32>
    %54 = arith.subf %50, %53 : vector<8x1xf32>
    %55 = math.exp %54 : vector<8x1xf32>
    %56 = vector.broadcast %53 : vector<8x1xf32> to vector<8x8xf32>
    %57 = arith.subf %48, %56 : vector<8x8xf32>
    %58 = math.exp %57 : vector<8x8xf32>
    %c1_42 = arith.constant 1 : index
    %c0_43 = arith.constant 0 : index
    %c0_44 = arith.constant 0 : index
    %59 = vector.load %arg8[%c1_42, %c0_43, %c0_44] : memref<4x8x1xf32, #tpu.memory_space<vmem>>, vector<1x8x1xf32>
    %60 = vector.shape_cast %59 : vector<1x8x1xf32> to vector<8x1xf32>
    %61 = arith.mulf %55, %60 : vector<8x1xf32>
    %cst_45 = arith.constant dense<0.000000e+00> : vector<8xf32>
    %62 = vector.multi_reduction <add>, %58, %cst_45 [1] : vector<8x8xf32> to vector<8xf32>
    %63 = vector.shape_cast %62 : vector<8xf32> to vector<8x1xf32>
    %64 = arith.addf %61, %63 : vector<8x1xf32>
    %c1_46 = arith.constant 1 : index
    %c0_47 = arith.constant 0 : index
    %c0_48 = arith.constant 0 : index
    %65 = vector.load %arg8[%c1_46, %c0_47, %c0_48] : memref<4x8x1xf32, #tpu.memory_space<vmem>>, vector<1x8x1xf32>
    %66 = vector.shape_cast %65 : vector<1x8x1xf32> to vector<8x1xf32>
    %67 = vector.shape_cast %64 : vector<8x1xf32> to vector<1x8x1xf32>
    tpu.vector_store %arg8[%c1_46, %c0_47, %c0_48], %67 {strides = array<i32>} : memref<4x8x1xf32, #tpu.memory_space<vmem>>, vector<1x8x1xf32>,
    %c0_49 = arith.constant 0 : index
    %c8_50 = arith.constant 8 : index
    %68 = vector.load %arg9[%c0_49, %c8_50] : memref<8x32xf32, #tpu.memory_space<vmem>>, vector<8x8xf32>
    %69 = vector.broadcast %55 : vector<8x1xf32> to vector<8x8xf32>
    %70 = arith.mulf %69, %68 : vector<8x8xf32>
    %cst_51 = arith.constant dense<0.000000e+00> : vector<8x8xf32>
    %71 = tpu.matmul %58, %47, %cst_51 {dimension_numbers = #tpu.dot_dimension_numbers<[1], [0], [0], [1], [0, 0, 1, 1], [], []>} : vector<8x8xf32>, vector<8x8xf32>, vector<8x8xf32> -> vector<8x8xf32>
    %72 = arith.addf %70, %71 : vector<8x8xf32>
    %c0_52 = arith.constant 0 : index
    %c8_53 = arith.constant 8 : index
    %73 = vector.load %arg9[%c0_52, %c8_53] : memref<8x32xf32, #tpu.memory_space<vmem>>, vector<8x8xf32>
    tpu.vector_store %arg9[%c0_52, %c8_53], %72 {strides = array<i32>} : memref<8x32xf32, #tpu.memory_space<vmem>>, vector<8x8xf32>,
    %c1_54 = arith.constant 1 : index
    %c0_55 = arith.constant 0 : index
    %c0_56 = arith.constant 0 : index
    %74 = vector.load %arg7[%c1_54, %c0_55, %c0_56] : memref<4x8x1xf32, #tpu.memory_space<vmem>>, vector<1x8x1xf32>
    %75 = vector.shape_cast %74 : vector<1x8x1xf32> to vector<8x1xf32>
    %76 = vector.shape_cast %53 : vector<8x1xf32> to vector<1x8x1xf32>
    tpu.vector_store %arg7[%c1_54, %c0_55, %c0_56], %76 {strides = array<i32>} : memref<4x8x1xf32, #tpu.memory_space<vmem>>, vector<1x8x1xf32>,
    %c0_57 = arith.constant 0 : index
    %c0_58 = arith.constant 0 : index
    %c16 = arith.constant 16 : index
    %77 = vector.load %arg3[%c0_57, %c0_58, %c16] : memref<1x8x32xf32, #tpu.memory_space<vmem>>, vector<1x8x8xf32>
    %78 = vector.shape_cast %77 : vector<1x8x8xf32> to vector<8x8xf32>
    %cst_59 = arith.constant 0.353553385 : f32
    %79 = vector.broadcast %cst_59 : f32 to vector<8x8xf32>
    %80 = arith.mulf %78, %79 : vector<8x8xf32>
    %c0_60 = arith.constant 0 : index
    %c0_61 = arith.constant 0 : index
    %c16_62 = arith.constant 16 : index
    %81 = vector.load %arg4[%c0_60, %c0_61, %c16_62] : memref<1x8x32xf32, #tpu.memory_space<vmem>>, vector<1x8x8xf32>
    %82 = vector.shape_cast %81 : vector<1x8x8xf32> to vector<8x8xf32>
    %c0_63 = arith.constant 0 : index
    %c0_64 = arith.constant 0 : index
    %c16_65 = arith.constant 16 : index
    %83 = vector.load %arg5[%c0_63, %c0_64, %c16_65] : memref<1x8x32xf32, #tpu.memory_space<vmem>>, vector<1x8x8xf32>
    %84 = vector.shape_cast %83 : vector<1x8x8xf32> to vector<8x8xf32>
    %cst_66 = arith.constant dense<0.000000e+00> : vector<8x8xf32>
    %85 = tpu.matmul %80, %82, %cst_66 {dimension_numbers = #tpu.dot_dimension_numbers<[1], [1], [0], [0], [0, 0, 1, 0], [], []>} : vector<8x8xf32>, vector<8x8xf32>, vector<8x8xf32> -> vector<8x8xf32>
    %c2 = arith.constant 2 : index
    %c0_67 = arith.constant 0 : index
    %c0_68 = arith.constant 0 : index
    %86 = vector.load %arg7[%c2, %c0_67, %c0_68] : memref<4x8x1xf32, #tpu.memory_space<vmem>>, vector<1x8x1xf32>
    %87 = vector.shape_cast %86 : vector<1x8x1xf32> to vector<8x1xf32>
    %cst_69 = arith.constant dense<0xFF800000> : vector<8xf32>
    %88 = vector.multi_reduction <maximumf>, %85, %cst_69 [1] : vector<8x8xf32> to vector<8xf32>
    %89 = vector.shape_cast %88 : vector<8xf32> to vector<8x1xf32>
    %90 = arith.maximumf %87, %89 : vector<8x1xf32>
    %91 = arith.subf %87, %90 : vector<8x1xf32>
    %92 = math.exp %91 : vector<8x1xf32>
    %93 = vector.broadcast %90 : vector<8x1xf32> to vector<8x8xf32>
    %94 = arith.subf %85, %93 : vector<8x8xf32>
    %95 = math.exp %94 : vector<8x8xf32>
    %c2_70 = arith.constant 2 : index
    %c0_71 = arith.constant 0 : index
    %c0_72 = arith.constant 0 : index
    %96 = vector.load %arg8[%c2_70, %c0_71, %c0_72] : memref<4x8x1xf32, #tpu.memory_space<vmem>>, vector<1x8x1xf32>
    %97 = vector.shape_cast %96 : vector<1x8x1xf32> to vector<8x1xf32>
    %98 = arith.mulf %92, %97 : vector<8x1xf32>
    %cst_73 = arith.constant dense<0.000000e+00> : vector<8xf32>
    %99 = vector.multi_reduction <add>, %95, %cst_73 [1] : vector<8x8xf32> to vector<8xf32>
    %100 = vector.shape_cast %99 : vector<8xf32> to vector<8x1xf32>
    %101 = arith.addf %98, %100 : vector<8x1xf32>
    %c2_74 = arith.constant 2 : index
    %c0_75 = arith.constant 0 : index
    %c0_76 = arith.constant 0 : index
    %102 = vector.load %arg8[%c2_74, %c0_75, %c0_76] : memref<4x8x1xf32, #tpu.memory_space<vmem>>, vector<1x8x1xf32>
    %103 = vector.shape_cast %102 : vector<1x8x1xf32> to vector<8x1xf32>
    %104 = vector.shape_cast %101 : vector<8x1xf32> to vector<1x8x1xf32>
    tpu.vector_store %arg8[%c2_74, %c0_75, %c0_76], %104 {strides = array<i32>} : memref<4x8x1xf32, #tpu.memory_space<vmem>>, vector<1x8x1xf32>,
    %c0_77 = arith.constant 0 : index
    %c16_78 = arith.constant 16 : index
    %105 = vector.load %arg9[%c0_77, %c16_78] : memref<8x32xf32, #tpu.memory_space<vmem>>, vector<8x8xf32>
    %106 = vector.broadcast %92 : vector<8x1xf32> to vector<8x8xf32>
    %107 = arith.mulf %106, %105 : vector<8x8xf32>
    %cst_79 = arith.constant dense<0.000000e+00> : vector<8x8xf32>
    %108 = tpu.matmul %95, %84, %cst_79 {dimension_numbers = #tpu.dot_dimension_numbers<[1], [0], [0], [1], [0, 0, 1, 1], [], []>} : vector<8x8xf32>, vector<8x8xf32>, vector<8x8xf32> -> vector<8x8xf32>
    %109 = arith.addf %107, %108 : vector<8x8xf32>
    %c0_80 = arith.constant 0 : index
    %c16_81 = arith.constant 16 : index
    %110 = vector.load %arg9[%c0_80, %c16_81] : memref<8x32xf32, #tpu.memory_space<vmem>>, vector<8x8xf32>
    tpu.vector_store %arg9[%c0_80, %c16_81], %109 {strides = array<i32>} : memref<8x32xf32, #tpu.memory_space<vmem>>, vector<8x8xf32>,
    %c2_82 = arith.constant 2 : index
    %c0_83 = arith.constant 0 : index
    %c0_84 = arith.constant 0 : index
    %111 = vector.load %arg7[%c2_82, %c0_83, %c0_84] : memref<4x8x1xf32, #tpu.memory_space<vmem>>, vector<1x8x1xf32>
    %112 = vector.shape_cast %111 : vector<1x8x1xf32> to vector<8x1xf32>
    %113 = vector.shape_cast %90 : vector<8x1xf32> to vector<1x8x1xf32>
    tpu.vector_store %arg7[%c2_82, %c0_83, %c0_84], %113 {strides = array<i32>} : memref<4x8x1xf32, #tpu.memory_space<vmem>>, vector<1x8x1xf32>,
    %c0_85 = arith.constant 0 : index
    %c0_86 = arith.constant 0 : index
    %c24 = arith.constant 24 : index
    %114 = vector.load %arg3[%c0_85, %c0_86, %c24] : memref<1x8x32xf32, #tpu.memory_space<vmem>>, vector<1x8x8xf32>
    %115 = vector.shape_cast %114 : vector<1x8x8xf32> to vector<8x8xf32>
    %cst_87 = arith.constant 0.353553385 : f32
    %116 = vector.broadcast %cst_87 : f32 to vector<8x8xf32>
    %117 = arith.mulf %115, %116 : vector<8x8xf32>
    %c0_88 = arith.constant 0 : index
    %c0_89 = arith.constant 0 : index
    %c24_90 = arith.constant 24 : index
    %118 = vector.load %arg4[%c0_88, %c0_89, %c24_90] : memref<1x8x32xf32, #tpu.memory_space<vmem>>, vector<1x8x8xf32>
    %119 = vector.shape_cast %118 : vector<1x8x8xf32> to vector<8x8xf32>
    %c0_91 = arith.constant 0 : index
    %c0_92 = arith.constant 0 : index
    %c24_93 = arith.constant 24 : index
    %120 = vector.load %arg5[%c0_91, %c0_92, %c24_93] : memref<1x8x32xf32, #tpu.memory_space<vmem>>, vector<1x8x8xf32>
    %121 = vector.shape_cast %120 : vector<1x8x8xf32> to vector<8x8xf32>
    %cst_94 = arith.constant dense<0.000000e+00> : vector<8x8xf32>
    %122 = tpu.matmul %117, %119, %cst_94 {dimension_numbers = #tpu.dot_dimension_numbers<[1], [1], [0], [0], [0, 0, 1, 0], [], []>} : vector<8x8xf32>, vector<8x8xf32>, vector<8x8xf32> -> vector<8x8xf32>
    %c3 = arith.constant 3 : index
    %c0_95 = arith.constant 0 : index
    %c0_96 = arith.constant 0 : index
    %123 = vector.load %arg7[%c3, %c0_95, %c0_96] : memref<4x8x1xf32, #tpu.memory_space<vmem>>, vector<1x8x1xf32>
    %124 = vector.shape_cast %123 : vector<1x8x1xf32> to vector<8x1xf32>
    %cst_97 = arith.constant dense<0xFF800000> : vector<8xf32>
    %125 = vector.multi_reduction <maximumf>, %122, %cst_97 [1] : vector<8x8xf32> to vector<8xf32>
    %126 = vector.shape_cast %125 : vector<8xf32> to vector<8x1xf32>
    %127 = arith.maximumf %124, %126 : vector<8x1xf32>
    %128 = arith.subf %124, %127 : vector<8x1xf32>
    %129 = math.exp %128 : vector<8x1xf32>
    %130 = vector.broadcast %127 : vector<8x1xf32> to vector<8x8xf32>
    %131 = arith.subf %122, %130 : vector<8x8xf32>
    %132 = math.exp %131 : vector<8x8xf32>
    %c3_98 = arith.constant 3 : index
    %c0_99 = arith.constant 0 : index
    %c0_100 = arith.constant 0 : index
    %133 = vector.load %arg8[%c3_98, %c0_99, %c0_100] : memref<4x8x1xf32, #tpu.memory_space<vmem>>, vector<1x8x1xf32>
    %134 = vector.shape_cast %133 : vector<1x8x1xf32> to vector<8x1xf32>
    %135 = arith.mulf %129, %134 : vector<8x1xf32>
    %cst_101 = arith.constant dense<0.000000e+00> : vector<8xf32>
    %136 = vector.multi_reduction <add>, %132, %cst_101 [1] : vector<8x8xf32> to vector<8xf32>
    %137 = vector.shape_cast %136 : vector<8xf32> to vector<8x1xf32>
    %138 = arith.addf %135, %137 : vector<8x1xf32>
    %c3_102 = arith.constant 3 : index
    %c0_103 = arith.constant 0 : index
    %c0_104 = arith.constant 0 : index
    %139 = vector.load %arg8[%c3_102, %c0_103, %c0_104] : memref<4x8x1xf32, #tpu.memory_space<vmem>>, vector<1x8x1xf32>
    %140 = vector.shape_cast %139 : vector<1x8x1xf32> to vector<8x1xf32>
    %141 = vector.shape_cast %138 : vector<8x1xf32> to vector<1x8x1xf32>
    tpu.vector_store %arg8[%c3_102, %c0_103, %c0_104], %141 {strides = array<i32>} : memref<4x8x1xf32, #tpu.memory_space<vmem>>, vector<1x8x1xf32>,
    %c0_105 = arith.constant 0 : index
    %c24_106 = arith.constant 24 : index
    %142 = vector.load %arg9[%c0_105, %c24_106] : memref<8x32xf32, #tpu.memory_space<vmem>>, vector<8x8xf32>
    %143 = vector.broadcast %129 : vector<8x1xf32> to vector<8x8xf32>
    %144 = arith.mulf %143, %142 : vector<8x8xf32>
    %cst_107 = arith.constant dense<0.000000e+00> : vector<8x8xf32>
    %145 = tpu.matmul %132, %121, %cst_107 {dimension_numbers = #tpu.dot_dimension_numbers<[1], [0], [0], [1], [0, 0, 1, 1], [], []>} : vector<8x8xf32>, vector<8x8xf32>, vector<8x8xf32> -> vector<8x8xf32>
    %146 = arith.addf %144, %145 : vector<8x8xf32>
    %c0_108 = arith.constant 0 : index
    %c24_109 = arith.constant 24 : index
    %147 = vector.load %arg9[%c0_108, %c24_109] : memref<8x32xf32, #tpu.memory_space<vmem>>, vector<8x8xf32>
    tpu.vector_store %arg9[%c0_108, %c24_109], %146 {strides = array<i32>} : memref<8x32xf32, #tpu.memory_space<vmem>>, vector<8x8xf32>,
    %c3_110 = arith.constant 3 : index
    %c0_111 = arith.constant 0 : index
    %c0_112 = arith.constant 0 : index
    %148 = vector.load %arg7[%c3_110, %c0_111, %c0_112] : memref<4x8x1xf32, #tpu.memory_space<vmem>>, vector<1x8x1xf32>
    %149 = vector.shape_cast %148 : vector<1x8x1xf32> to vector<8x1xf32>
    %150 = vector.shape_cast %127 : vector<8x1xf32> to vector<1x8x1xf32>
    tpu.vector_store %arg7[%c3_110, %c0_111, %c0_112], %150 {strides = array<i32>} : memref<4x8x1xf32, #tpu.memory_space<vmem>>, vector<1x8x1xf32>,
    %c0_i32_113 = arith.constant 0 : i32
    %151 = arith.cmpi eq, %arg2, %c0_i32_113 : i32
    %152 = arith.extui %151 : i1 to i32
    %c0_i32_114 = arith.constant 0 : i32
    %153 = arith.cmpi ne, %152, %c0_i32_114 : i32
    scf.if %153 {
      %c0_115 = arith.constant 0 : index
      %c0_116 = arith.constant 0 : index
      %c0_117 = arith.constant 0 : index
      %154 = vector.load %arg8[%c0_115, %c0_116, %c0_117] : memref<4x8x1xf32, #tpu.memory_space<vmem>>, vector<1x8x1xf32>
      %155 = vector.shape_cast %154 : vector<1x8x1xf32> to vector<8x1xf32>
      %156 = tpu.reciprocal %155 {approx = true} : vector<8x1xf32> -> vector<8x1xf32>
      %c0_118 = arith.constant 0 : index
      %c0_119 = arith.constant 0 : index
      %157 = vector.load %arg9[%c0_118, %c0_119] : memref<8x32xf32, #tpu.memory_space<vmem>>, vector<8x8xf32>
      %158 = vector.broadcast %156 : vector<8x1xf32> to vector<8x8xf32>
      %159 = arith.mulf %157, %158 : vector<8x8xf32>
      %c0_120 = arith.constant 0 : index
      %c0_121 = arith.constant 0 : index
      %c0_122 = arith.constant 0 : index
      %160 = vector.load %arg6[%c0_120, %c0_121, %c0_122] : memref<1x8x32xf32, #tpu.memory_space<vmem>>, vector<1x8x8xf32>
      %161 = vector.shape_cast %160 : vector<1x8x8xf32> to vector<8x8xf32>
      %162 = vector.shape_cast %159 : vector<8x8xf32> to vector<1x8x8xf32>
      tpu.vector_store %arg6[%c0_120, %c0_121, %c0_122], %162 {strides = array<i32>} : memref<1x8x32xf32, #tpu.memory_space<vmem>>, vector<1x8x8xf32>,
      %c1_123 = arith.constant 1 : index
      %c0_124 = arith.constant 0 : index
      %c0_125 = arith.constant 0 : index
      %163 = vector.load %arg8[%c1_123, %c0_124, %c0_125] : memref<4x8x1xf32, #tpu.memory_space<vmem>>, vector<1x8x1xf32>
      %164 = vector.shape_cast %163 : vector<1x8x1xf32> to vector<8x1xf32>
      %165 = tpu.reciprocal %164 {approx = true} : vector<8x1xf32> -> vector<8x1xf32>
      %c0_126 = arith.constant 0 : index
      %c8_127 = arith.constant 8 : index
      %166 = vector.load %arg9[%c0_126, %c8_127] : memref<8x32xf32, #tpu.memory_space<vmem>>, vector<8x8xf32>
      %167 = vector.broadcast %165 : vector<8x1xf32> to vector<8x8xf32>
      %168 = arith.mulf %166, %167 : vector<8x8xf32>
      %c0_128 = arith.constant 0 : index
      %c0_129 = arith.constant 0 : index
      %c8_130 = arith.constant 8 : index
      %169 = vector.load %arg6[%c0_128, %c0_129, %c8_130] : memref<1x8x32xf32, #tpu.memory_space<vmem>>, vector<1x8x8xf32>
      %170 = vector.shape_cast %169 : vector<1x8x8xf32> to vector<8x8xf32>
      %171 = vector.shape_cast %168 : vector<8x8xf32> to vector<1x8x8xf32>
      tpu.vector_store %arg6[%c0_128, %c0_129, %c8_130], %171 {strides = array<i32>} : memref<1x8x32xf32, #tpu.memory_space<vmem>>, vector<1x8x8xf32>,
      %c2_131 = arith.constant 2 : index
      %c0_132 = arith.constant 0 : index
      %c0_133 = arith.constant 0 : index
      %172 = vector.load %arg8[%c2_131, %c0_132, %c0_133] : memref<4x8x1xf32, #tpu.memory_space<vmem>>, vector<1x8x1xf32>
      %173 = vector.shape_cast %172 : vector<1x8x1xf32> to vector<8x1xf32>
      %174 = tpu.reciprocal %173 {approx = true} : vector<8x1xf32> -> vector<8x1xf32>
      %c0_134 = arith.constant 0 : index
      %c16_135 = arith.constant 16 : index
      %175 = vector.load %arg9[%c0_134, %c16_135] : memref<8x32xf32, #tpu.memory_space<vmem>>, vector<8x8xf32>
      %176 = vector.broadcast %174 : vector<8x1xf32> to vector<8x8xf32>
      %177 = arith.mulf %175, %176 : vector<8x8xf32>
      %c0_136 = arith.constant 0 : index
      %c0_137 = arith.constant 0 : index
      %c16_138 = arith.constant 16 : index
      %178 = vector.load %arg6[%c0_136, %c0_137, %c16_138] : memref<1x8x32xf32, #tpu.memory_space<vmem>>, vector<1x8x8xf32>
      %179 = vector.shape_cast %178 : vector<1x8x8xf32> to vector<8x8xf32>
      %180 = vector.shape_cast %177 : vector<8x8xf32> to vector<1x8x8xf32>
      tpu.vector_store %arg6[%c0_136, %c0_137, %c16_138], %180 {strides = array<i32>} : memref<1x8x32xf32, #tpu.memory_space<vmem>>, vector<1x8x8xf32>,
      %c3_139 = arith.constant 3 : index
      %c0_140 = arith.constant 0 : index
      %c0_141 = arith.constant 0 : index
      %181 = vector.load %arg8[%c3_139, %c0_140, %c0_141] : memref<4x8x1xf32, #tpu.memory_space<vmem>>, vector<1x8x1xf32>
      %182 = vector.shape_cast %181 : vector<1x8x1xf32> to vector<8x1xf32>
      %183 = tpu.reciprocal %182 {approx = true} : vector<8x1xf32> -> vector<8x1xf32>
      %c0_142 = arith.constant 0 : index
      %c24_143 = arith.constant 24 : index
      %184 = vector.load %arg9[%c0_142, %c24_143] : memref<8x32xf32, #tpu.memory_space<vmem>>, vector<8x8xf32>
      %185 = vector.broadcast %183 : vector<8x1xf32> to vector<8x8xf32>
      %186 = arith.mulf %184, %185 : vector<8x8xf32>
      %c0_144 = arith.constant 0 : index
      %c0_145 = arith.constant 0 : index
      %c24_146 = arith.constant 24 : index
      %187 = vector.load %arg6[%c0_144, %c0_145, %c24_146] : memref<1x8x32xf32, #tpu.memory_space<vmem>>, vector<1x8x8xf32>
      %188 = vector.shape_cast %187 : vector<1x8x8xf32> to vector<8x8xf32>
      %189 = vector.shape_cast %186 : vector<8x8xf32> to vector<1x8x8xf32>
      tpu.vector_store %arg6[%c0_144, %c0_145, %c24_146], %189 {strides = array<i32>} : memref<1x8x32xf32, #tpu.memory_space<vmem>>, vector<1x8x8xf32>,
    } else {
    }
    return
  }
  func.func @transform_0(%arg0: i32, %arg1: i32, %arg2: i32) -> (i32, i32, i32) {
    %c0_i32 = arith.constant 0 : i32
    %c0_i32_0 = arith.constant 0 : i32
    return %arg0, %arg1, %c0_i32 : i32, i32, i32
  }
  func.func @transform_1(%arg0: i32, %arg1: i32, %arg2: i32) -> (i32, i32, i32) {
    %c0_i32 = arith.constant 0 : i32
    %c0_i32_0 = arith.constant 0 : i32
    return %arg0, %arg2, %c0_i32 : i32, i32, i32
  }
  func.func @transform_2(%arg0: i32, %arg1: i32, %arg2: i32) -> (i32, i32, i32) {
    %c0_i32 = arith.constant 0 : i32
    %c0_i32_0 = arith.constant 0 : i32
    return %arg0, %arg2, %c0_i32 : i32, i32, i32
  }
  func.func @transform_3(%arg0: i32, %arg1: i32, %arg2: i32) -> (i32, i32, i32) {
    %c0_i32 = arith.constant 0 : i32
    %c0_i32_0 = arith.constant 0 : i32
    return %arg0, %arg1, %c0_i32 : i32, i32, i32
  }
}

module attributes {stable_mosaic.version = 11 : i64} {
  func.func @_matmul_kernel(%arg0: i32, %arg1: i32, %arg2: i32, %arg3: memref<16x32xf32, #tpu.memory_space<vmem>>, %arg4: memref<32x32xf32, #tpu.memory_space<vmem>>, %arg5: memref<1x32xf32, #tpu.memory_space<vmem>>, %arg6: memref<16x32xf32, #tpu.memory_space<vmem>>, %arg7: memref<16x32xf32, #tpu.memory_space<vmem>>) attributes {dimension_semantics = [#tpu.dimension_semantics<parallel>, #tpu.dimension_semantics<parallel>, #tpu.dimension_semantics<arbitrary>], iteration_bounds = array<i64: 1, 1, 1>, scalar_prefetch = 0 : i64, scratch_operands = 1 : i64, tpu.core_type = #tpu.core_type<tc>, window_params = [{transform_indices = @transform_0, window_bounds = array<i64: 16, 32>}, {transform_indices = @transform_1, window_bounds = array<i64: 32, 32>}, {transform_indices = @transform_2, window_bounds = array<i64: 1, 32>}, {transform_indices = @transform_3, window_bounds = array<i64: 16, 32>}]} {
    %c0_i32 = arith.constant 0 : i32
    %0 = arith.cmpi eq, %arg2, %c0_i32 : i32
    %1 = arith.extui %0 : i1 to i32
    %c0_i32_0 = arith.constant 0 : i32
    %2 = arith.cmpi ne, %1, %c0_i32_0 : i32
    scf.if %2 {
      %cst_10 = arith.constant 0.000000e+00 : f32
      %12 = vector.broadcast %cst_10 : f32 to vector<16x32xf32>
      %c0_11 = arith.constant 0 : index
      %c0_12 = arith.constant 0 : index
      %13 = vector.load %arg7[%c0_11, %c0_12] : memref<16x32xf32, #tpu.memory_space<vmem>>, vector<16x32xf32>
      tpu.vector_store %arg7[%c0_11, %c0_12], %12 {strides = array<i32>} : memref<16x32xf32, #tpu.memory_space<vmem>>, vector<16x32xf32>,
    } else {
    }
    %c0 = arith.constant 0 : index
    %c0_1 = arith.constant 0 : index
    %3 = vector.load %arg7[%c0, %c0_1] : memref<16x32xf32, #tpu.memory_space<vmem>>, vector<16x32xf32>
    %c0_2 = arith.constant 0 : index
    %c0_3 = arith.constant 0 : index
    %4 = vector.load %arg3[%c0_2, %c0_3] : memref<16x32xf32, #tpu.memory_space<vmem>>, vector<16x32xf32>
    %c0_4 = arith.constant 0 : index
    %c0_5 = arith.constant 0 : index
    %5 = vector.load %arg4[%c0_4, %c0_5] : memref<32x32xf32, #tpu.memory_space<vmem>>, vector<32x32xf32>
    %cst = arith.constant dense<0.000000e+00> : vector<16x32xf32>
    %6 = tpu.matmul %4, %5, %cst {dimension_numbers = #tpu.dot_dimension_numbers<[1], [0], [0], [1], [0, 0, 1, 1], [], []>} : vector<16x32xf32>, vector<32x32xf32>, vector<16x32xf32> -> vector<16x32xf32>
    %7 = arith.addf %3, %6 : vector<16x32xf32>
    %c0_6 = arith.constant 0 : index
    %c0_7 = arith.constant 0 : index
    %8 = vector.load %arg7[%c0_6, %c0_7] : memref<16x32xf32, #tpu.memory_space<vmem>>, vector<16x32xf32>
    tpu.vector_store %arg7[%c0_6, %c0_7], %7 {strides = array<i32>} : memref<16x32xf32, #tpu.memory_space<vmem>>, vector<16x32xf32>,
    %c0_i32_8 = arith.constant 0 : i32
    %9 = arith.cmpi eq, %arg2, %c0_i32_8 : i32
    %10 = arith.extui %9 : i1 to i32
    %c0_i32_9 = arith.constant 0 : i32
    %11 = arith.cmpi ne, %10, %c0_i32_9 : i32
    scf.if %11 {
      %c0_10 = arith.constant 0 : index
      %c0_11 = arith.constant 0 : index
      %12 = vector.load %arg7[%c0_10, %c0_11] : memref<16x32xf32, #tpu.memory_space<vmem>>, vector<16x32xf32>
      %c0_12 = arith.constant 0 : index
      %c0_13 = arith.constant 0 : index
      %13 = vector.load %arg5[%c0_12, %c0_13] : memref<1x32xf32, #tpu.memory_space<vmem>>, vector<1x32xf32>
      %14 = vector.broadcast %13 : vector<1x32xf32> to vector<16x32xf32>
      %15 = arith.addf %12, %14 : vector<16x32xf32>
      %c0_14 = arith.constant 0 : index
      %c0_15 = arith.constant 0 : index
      %16 = vector.load %arg6[%c0_14, %c0_15] : memref<16x32xf32, #tpu.memory_space<vmem>>, vector<16x32xf32>
      tpu.vector_store %arg6[%c0_14, %c0_15], %15 {strides = array<i32>} : memref<16x32xf32, #tpu.memory_space<vmem>>, vector<16x32xf32>,
    } else {
    }
    return
  }
  func.func @transform_0(%arg0: i32, %arg1: i32, %arg2: i32) -> (i32, i32) {
    %c0_i32 = arith.constant 0 : i32
    return %arg0, %arg2 : i32, i32
  }
  func.func @transform_1(%arg0: i32, %arg1: i32, %arg2: i32) -> (i32, i32) {
    %c0_i32 = arith.constant 0 : i32
    return %arg2, %arg1 : i32, i32
  }
  func.func @transform_2(%arg0: i32, %arg1: i32, %arg2: i32) -> (i32, i32) {
    %c0_i32 = arith.constant 0 : i32
    %c0_i32_0 = arith.constant 0 : i32
    return %c0_i32, %arg1 : i32, i32
  }
  func.func @transform_3(%arg0: i32, %arg1: i32, %arg2: i32) -> (i32, i32) {
    %c0_i32 = arith.constant 0 : i32
    return %arg0, %arg1 : i32, i32
  }
}

</mosaic_0001>

<bundles_post_ra>
// kernel: multi_head_attention.5
= control target key start
LH: loop header
LB: loop body
LE: loop exit
PB: predicated region body
PF: predicated region fallthrough
CT: control target
= control target key end

     0   :  { %vm19_vm0 = vcmask 261120   ;;  %v132_v2 = vmov 0.0   ;;  %s188_s0 = inlined_call_operand.vmem [shape: f32[16,32], index: 0, kind: input, shape index: {}]   ;;  %s189_s1 = inlined_call_operand.vmem [shape: f32[32,32], index: 1, kind: input, shape index: {}]   ;;  %s190_s2 = inlined_call_operand.vmem [shape: f32[1,32], index: 2, kind: input, shape index: {}]   ;;  %s191_s3 = inlined_call_operand.hbm [shape: f32[16,32], index: 3, kind: output, shape index: {}]  }
   0x1   :  { %v29_v0 = vld [vmem:[%s189_s1 + $0x18] sm:$0xff]  ;;  %v28_v1 = vld [vmem:[%s189_s1 + $0x10] sm:$0xff]  ;;  %20 = vst.msk [vmem:[#allocation2] sm:$0xff] %vm19_vm0, %v132_v2  ;;  %v27_v3 = vld [vmem:[%s189_s1 + $0x8] sm:$0xff] }
   0x2   :  { %49 = vmatpush.msra.mxu0 %v29_v0  ;;  %97 = vmatpush.msra.mxu1 %v29_v0  ;;  %21 = vst.msk [vmem:[#allocation2 + $0x8] sm:$0xff] %vm19_vm0, %v132_v2 }
   0x3   :  { %8 = vsyncpa [#allocation4], 0  ;;  %v26_v4 = vld [vmem:[%s189_s1] sm:$0xff]  ;;  %v25_v6 = vld [vmem:[%s188_s0 + $0x8] sm:$0xff]  ;;  %s83_s28 = sshll.u32 %s191_s3, 4  ;;  %s134_s29 = smov 128   ;;  %s84_s28 = int_to_ptr.hbm [resolvable:$true] %s83_s28 }
   0x4   :  { %50 = vmatpush.msra.mxu0 %v28_v1  ;;  %98 = vmatpush.msra.mxu1 %v28_v1  ;;  %v24_v5 = vld [vmem:[%s188_s0] sm:$0xff]  ;;  %s133_s0 = smov [#allocation3]   ;;  %s135_s30 = smov 8  }
   0x5   :  { %v105_v13 = vld [vmem:[%s190_s2] ss:$0 sm:$0xff]  ;;  %s81_s25 = sshll.u32 %s133_s0, 4  ;;  %s82_s25 = int_to_ptr.vmem [resolvable:$true] %s81_s25 }
   0x6   :  { %51 = vmatpush.msra.mxu0 %v27_v3  ;;  %99 = vmatpush.msra.mxu1 %v27_v3 }
   0x8   :  { %52 = vmatpush.msra.mxu0 %v26_v4  ;;  %100 = vmatpush.msra.mxu1 %v26_v4  ;;  %v22_v7 = vld [vmem:[#allocation2] sm:$0xff] }
   0x9   :  { %95 = vmatmul.msk.f32.vlgmr.msra.gmra.mxu0 %vm19_vm0, %v24_v5  ;;  %96 = vmatmul.msk.f32.vlgmr.msra.gmra.mxu1 %vm19_vm0, %v25_v6  ;;  %v23_v8 = vld [vmem:[#allocation2 + $0x8] sm:$0xff] }
  0x86   :  { %v54_v9 = vpop.f32.mrf.mxu0  ;;  %v57_v10 = vpop.f32.mrf.mxu1 }
  0x87   :  { %v60_v11 = vadd.f32 %v54_v9, %v22_v7  ;;  %v61_v12 = vadd.f32 %v57_v10, %v23_v8 }
  0x89   :  { %62 = vst.msk [vmem:[#allocation2] sm:$0xff] %vm19_vm0, %v60_v11 }
  0x8a   :  { %63 = vst.msk [vmem:[#allocation2 + $0x8] sm:$0xff] %vm19_vm0, %v61_v12 }
  0x90   :  { %v67_v14 = vld [vmem:[#allocation2] sm:$0xff] }
  0x91   :  { %v68_v15 = vld [vmem:[#allocation2 + $0x8] sm:$0xff]  ;;  %v73_v16 = vadd.f32 %v105_v13, %v67_v14 }
  0x92   :  { %v74_v17 = vadd.f32 %v105_v13, %v68_v15 }
  0x93   :  { %75 = vst.msk [vmem:[#allocation3] sm:$0xff] %vm19_vm0, %v73_v16 }
  0x94   :  { %76 = vst.msk [vmem:[#allocation3 + $0x8] sm:$0xff] %vm19_vm0, %v74_v17 }
  0x95   :  { %89 = dma.vmem_to_hbm [thread:$0]  %s82_s25, 256, %s84_s28, [#allocation4], %s134_s29, %s134_s29, %s135_s30  }
  0x96   :  { %130 = dma.done.wait [#allocation4], 256  }
  0x97   :  { %131 = vsyncadd [#allocation4], 4294967040 }
  0x98   :  { %94 = vsyncpa [#allocation4], 1 }

// kernel: multi_head_attention.3
= control target key start
LH: loop header
LB: loop body
LE: loop exit
PB: predicated region body
PF: predicated region fallthrough
CT: control target
= control target key end

     0   :  { %13 = vsyncpa [#allocation6], 0  ;;  %s544_s0 = inlined_call_operand.hbm [shape: f32[16,32], index: 0, kind: input, shape index: {}]   ;;  %s545_s1 = inlined_call_operand.hbm [shape: f32[16,32], index: 1, kind: input, shape index: {}]   ;;  %s546_s2 = inlined_call_operand.hbm [shape: f32[16,32], index: 2, kind: input, shape index: {}]   ;;  %s547_s3 = inlined_call_operand.hbm [shape: f32[3,32,32], index: 3, kind: input, shape index: {}]   ;;  %s548_s4 = inlined_call_operand.hbm [shape: f32[3,1,32], index: 4, kind: input, shape index: {}]   ;;  %s549_s5 = inlined_call_operand.vmem [shape: f32[16,32], index: 5, kind: output, shape index: {0}]   ;;  %s550_s6 = inlined_call_operand.vmem [shape: f32[16,32], index: 6, kind: output, shape index: {1}]   ;;  %s551_s7 = inlined_call_operand.vmem [shape: f32[16,32], index: 7, kind: output, shape index: {2}]  }
   0x1   :  { %14 = vsyncpa [#allocation8], 0 }
   0x2   :  { %15 = vsyncpa [#allocation11], 0  ;;  %s33_s26 = sshll.u32 %s545_s1, 4  ;;  %s437_s27 = smov [#allocation7]   ;;  %s34_s26 = int_to_ptr.hbm [resolvable:$true] %s33_s26 }
   0x3   :  { %s35_s28 = sshll.u32 %s437_s27, 4  ;;  %s59_s8 = sshll.u32 %s547_s3, 4  ;;  %s36_s28 = int_to_ptr.vmem [resolvable:$true] %s35_s28  ;;  %s60_s8 = int_to_ptr.hbm [resolvable:$true] %s59_s8 }
   0x4   :  { %s438_s9 = smov 128   ;;  %s439_s10 = smov 8  }
   0x5   :  { %41 = dma.hbm_to_vmem [thread:$0]  %s34_s26, 256, %s36_s28, [#allocation8], %s438_s9, %s438_s9, %s439_s10  }
   0x6   :  { %s440_s11 = smov [#allocation10]   ;;  %s20_s15 = sshll.u32 %s544_s0, 4  ;;  %s21_s15 = int_to_ptr.hbm [resolvable:$true] %s20_s15 }
   0x7   :  { %s61_s12 = sshll.u32 %s440_s11, 4  ;;  %s46_s17 = sshll.u32 %s546_s2, 4  ;;  %s62_s12 = int_to_ptr.vmem [resolvable:$true] %s61_s12  ;;  %s47_s17 = int_to_ptr.hbm [resolvable:$true] %s46_s17 }
   0x8   :  { %67 = dma.hbm_to_vmem [thread:$0]  %s60_s8, 1536, %s62_s12, [#allocation11], %s438_s9, %s438_s9, %s439_s10  }
   0x9   :  { %s441_s18 = smov [#allocation5]   ;;  %s442_s3 = smov [#allocation9]  }
   0xa   :  { %s22_s19 = sshll.u32 %s441_s18, 4  ;;  %s48_s20 = sshll.u32 %s442_s3, 4  ;;  %s23_s19 = int_to_ptr.vmem [resolvable:$true] %s22_s19  ;;  %s49_s20 = int_to_ptr.vmem [resolvable:$true] %s48_s20 }
   0xb   :  { %28 = dma.hbm_to_vmem [thread:$0]  %s21_s15, 256, %s23_s19, [#allocation6], %s438_s9, %s438_s9, %s439_s10  }
   0xc   :  { %s72_s23 = sshll.u32 %s548_s4, 4  ;;  %s443_s0 = smov [#allocation12]   ;;  %s73_s23 = int_to_ptr.hbm [resolvable:$true] %s72_s23 }
   0xd   :  { %54 = dma.hbm_to_vmem [thread:$0]  %s47_s17, 256, %s49_s20, [#allocation8], %s438_s9, %s438_s9, %s439_s10  }
   0xe   :  { %s74_s24 = sshll.u32 %s443_s0, 4  ;;  %s444_s25 = smov 16   ;;  %s75_s24 = int_to_ptr.vmem [resolvable:$true] %s74_s24 }
   0xf   :  { %s445_s26 = smov 1  }
  0x10   :  { %80 = dma.hbm_to_vmem [thread:$0]  %s73_s23, 48, %s75_s24, [#allocation11], %s444_s25, %s444_s25, %s445_s26  }
  0x11   :  { %431 = dma.done.wait [#allocation6], 256  }
  0x12   :  { %432 = vsyncadd [#allocation6], 4294967040 }
  0x13   :  { %433 = dma.done.wait [#allocation8], 512  }
  0x14   :  { %434 = vsyncadd [#allocation8], 4294966784 }
  0x15   :  { %435 = dma.done.wait [#allocation11], 1584  }
  0x16   :  { %436 = vsyncadd [#allocation11], 4294965712  ;;  %vm105_vm0 = vcmask 261120   ;;  %v446_v0 = vmov 0.0   ;;  %v204_v1 = vld [vmem:[#allocation10 + $0x58] sm:$0xff]  ;;  %v203_v2 = vld [vmem:[#allocation10 + $0x50] sm:$0xff] }
  0x17   :  { %108 = vst.msk [vmem:[#allocation3] sm:$0xff] %vm105_vm0, %v446_v0  ;;  %223 = vmatpush.msra.mxu2 %v204_v1  ;;  %v202_v3 = vld [vmem:[#allocation10 + $0x48] sm:$0xff]  ;;  %v162_v4 = vld [vmem:[#allocation10 + $0x38] sm:$0xff]  ;;  %v161_v6 = vld [vmem:[#allocation10 + $0x30] sm:$0xff] }
  0x18   :  { %106 = vst.msk [vmem:[#allocation2] sm:$0xff] %vm105_vm0, %v446_v0  ;;  %181 = vmatpush.msra.mxu1 %v162_v4  ;;  %v119_v5 = vld [vmem:[#allocation10 + $0x18] sm:$0xff]  ;;  %v118_v7 = vld [vmem:[#allocation10 + $0x10] sm:$0xff]  ;;  %v160_v8 = vld [vmem:[#allocation10 + $0x28] sm:$0xff] }
  0x19   :  { %107 = vst.msk [vmem:[#allocation2 + $0x8] sm:$0xff] %vm105_vm0, %v446_v0  ;;  %224 = vmatpush.msra.mxu2 %v203_v2  ;;  %294 = vmatpush.msra.mxu3 %v119_v5  ;;  %v201_v9 = vld [vmem:[#allocation10 + $0x40] sm:$0xff]  ;;  %v117_v10 = vld [vmem:[#allocation10 + $0x8] sm:$0xff]  ;;  %v198_v11 = vld [vmem:[#allocation9] sm:$0xff] }
  0x1a   :  { %109 = vst.msk [vmem:[#allocation3 + $0x8] sm:$0xff] %vm105_vm0, %v446_v0  ;;  %182 = vmatpush.msra.mxu1 %v161_v6  ;;  %139 = vmatpush.msra.mxu0 %v119_v5  ;;  %v159_v12 = vld [vmem:[#allocation10 + $0x20] sm:$0xff]  ;;  %v115_v15 = vld [vmem:[#allocation5 + $0x8] sm:$0xff]  ;;  %v114_v16 = vld [vmem:[#allocation5] sm:$0xff] }
  0x1b   :  { %110 = vst.msk [vmem:[#allocation4] sm:$0xff] %vm105_vm0, %v446_v0  ;;  %225 = vmatpush.msra.mxu2 %v202_v3  ;;  %295 = vmatpush.msra.mxu3 %v118_v7  ;;  %v156_v13 = vld [vmem:[#allocation7] sm:$0xff]  ;;  %v199_v17 = vld [vmem:[#allocation9 + $0x8] sm:$0xff]  ;;  %v157_v18 = vld [vmem:[#allocation7 + $0x8] sm:$0xff] }
  0x1c   :  { %111 = vst.msk [vmem:[#allocation4 + $0x8] sm:$0xff] %vm105_vm0, %v446_v0  ;;  %183 = vmatpush.msra.mxu1 %v160_v8  ;;  %v116_v14 = vld [vmem:[#allocation10] sm:$0xff]  ;;  %140 = vmatpush.msra.mxu0 %v118_v7 }
  0x1d   :  { %226 = vmatpush.msra.mxu2 %v201_v9  ;;  %296 = vmatpush.msra.mxu3 %v117_v10  ;;  %v308_v30 = vld [vmem:[#allocation12 + $0x1] ss:$0 sm:$0xff]  ;;  %v310_v37 = vld [vmem:[#allocation12] ss:$0 sm:$0xff]  ;;  %v309_v39 = vld [vmem:[#allocation12 + $0x2] ss:$0 sm:$0xff] }
  0x1e   :  { %292 = vmatmul.msk.f32.vlgmr.msra.gmra.mxu2 %vm105_vm0, %v198_v11  ;;  %184 = vmatpush.msra.mxu1 %v159_v12  ;;  %v154_v19 = vld [vmem:[#allocation3] sm:$0xff] }
  0x1f   :  { %290 = vmatmul.msk.f32.vlgmr.msra.gmra.mxu1 %vm105_vm0, %v156_v13  ;;  %297 = vmatpush.msra.mxu3 %v116_v14  ;;  %v112_v22 = vld [vmem:[#allocation2] sm:$0xff] }
  0x20   :  { %289 = vmatmul.msk.f32.vlgmr.msra.gmra.mxu3 %vm105_vm0, %v115_v15  ;;  %141 = vmatpush.msra.mxu0 %v117_v10  ;;  %v113_v27 = vld [vmem:[#allocation2 + $0x8] sm:$0xff] }
  0x21   :  { %v155_v29 = vld [vmem:[#allocation3 + $0x8] sm:$0xff] }
  0x22   :  { %142 = vmatpush.msra.mxu0 %v116_v14  ;;  %v196_v23 = vld [vmem:[#allocation4] sm:$0xff] }
  0x23   :  { %288 = vmatmul.msk.f32.vlgmr.msra.gmra.mxu0 %vm105_vm0, %v114_v16  ;;  %v197_v38 = vld [vmem:[#allocation4 + $0x8] sm:$0xff] }
  0x26   :  { %293 = vmatmul.msk.f32.gmra.mxu2 %vm105_vm0, %v199_v17 }
  0x27   :  { %291 = vmatmul.msk.f32.gmra.mxu1 %vm105_vm0, %v157_v18 }
  0x9c   :  { %v186_v20 = vpop.f32.mrf.mxu1 }
  0x9d   :  { %v192_v21 = vadd.f32 %v186_v20, %v154_v19 }
  0x9f   :  { %194 = vst.msk [vmem:[#allocation3] sm:$0xff] %vm105_vm0, %v192_v21 }
  0xa0   :  { %v144_v24 = vpop.f32.mrf.mxu0 }
  0xa1   :  { %v228_v25 = vpop.f32.mrf.mxu2  ;;  %v150_v26 = vadd.f32 %v144_v24, %v112_v22 }
  0xa2   :  { %v234_v28 = vadd.f32 %v228_v25, %v196_v23 }
  0xa3   :  { %152 = vst.msk [vmem:[#allocation2] sm:$0xff] %vm105_vm0, %v150_v26  ;;  %v147_v31 = vpop.f32.mrf.mxu3 }
  0xa4   :  { %236 = vst.msk [vmem:[#allocation4] sm:$0xff] %vm105_vm0, %v234_v28  ;;  %v151_v32 = vadd.f32 %v147_v31, %v113_v27  ;;  %v189_v33 = vpop.f32.mrf.mxu1 }
  0xa5   :  { %v193_v34 = vadd.f32 %v189_v33, %v155_v29 }
  0xa6   :  { %v251_v35 = vld [vmem:[#allocation3] sm:$0xff]  ;;  %153 = vst.msk [vmem:[#allocation2 + $0x8] sm:$0xff] %vm105_vm0, %v151_v32 }
  0xa7   :  { %v258_v36 = vadd.f32 %v308_v30, %v251_v35  ;;  %195 = vst.msk [vmem:[#allocation3 + $0x8] sm:$0xff] %vm105_vm0, %v193_v34 }
  0xa9   :  { %260 = vst.msk [vmem:[%s550_s6] sm:$0xff] %vm105_vm0, %v258_v36  ;;  %v231_v40 = vpop.f32.mrf.mxu2 }
  0xaa   :  { %v241_v41 = vld [vmem:[#allocation2] sm:$0xff]  ;;  %v235_v42 = vadd.f32 %v231_v40, %v197_v38 }
  0xab   :  { %v262_v43 = vld [vmem:[#allocation4] sm:$0xff]  ;;  %v247_v44 = vadd.f32 %v310_v37, %v241_v41 }
  0xac   :  { %v269_v45 = vadd.f32 %v309_v39, %v262_v43  ;;  %237 = vst.msk [vmem:[#allocation4 + $0x8] sm:$0xff] %vm105_vm0, %v235_v42 }
  0xad   :  { %249 = vst.msk [vmem:[%s549_s5] sm:$0xff] %vm105_vm0, %v247_v44  ;;  %v242_v46 = vld [vmem:[#allocation2 + $0x8] sm:$0xff] }
  0xae   :  { %271 = vst.msk [vmem:[%s551_s7] sm:$0xff] %vm105_vm0, %v269_v45  ;;  %v248_v47 = vadd.f32 %v310_v37, %v242_v46  ;;  %v252_v48 = vld [vmem:[#allocation3 + $0x8] sm:$0xff] }
  0xaf   :  { %v259_v49 = vadd.f32 %v308_v30, %v252_v48 }
  0xb0   :  { %250 = vst.msk [vmem:[%s549_s5 + $0x8] sm:$0xff] %vm105_vm0, %v248_v47 }
  0xb1   :  { %261 = vst.msk [vmem:[%s550_s6 + $0x8] sm:$0xff] %vm105_vm0, %v259_v49 }
  0xb3   :  { %v263_v50 = vld [vmem:[#allocation4 + $0x8] sm:$0xff] }
  0xb4   :  { %v270_v51 = vadd.f32 %v309_v39, %v263_v50 }
  0xb6   :  { %272 = vst.msk [vmem:[%s551_s7 + $0x8] sm:$0xff] %vm105_vm0, %v270_v51 }
  0xb7   :  { %285 = vsyncpa [#allocation6], 1 }
  0xb8   :  { %286 = vsyncpa [#allocation8], 1 }
  0xb9   :  { %287 = vsyncpa [#allocation11], 1 }

// kernel: multi_head_attention.4
= control target key start
LH: loop header
LB: loop body
LE: loop exit
PB: predicated region body
PF: predicated region fallthrough
CT: control target
= control target key end

     0   :  { %s952_s12 = smov 0   ;;  %s954_s13 = smov 0   ;;  %s1082_s0 = inlined_call_operand.vmem [shape: f32[2,8,32], index: 0, kind: input, shape index: {}]   ;;  %s1083_s1 = inlined_call_operand.vmem [shape: f32[2,8,32], index: 1, kind: input, shape index: {}]   ;;  %s1084_s2 = inlined_call_operand.vmem [shape: f32[2,8,32], index: 2, kind: input, shape index: {}]   ;;  %s1085_s3 = inlined_call_operand.vmem [shape: f32[2,8,32], index: 3, kind: output, shape index: {}]  }
   0x1   :  { %s956_s14 = smov 0  }
   0x2 LB: > { %s32_s15 = sadd.s32 1, %s917_s13  ;;  %p820_p0 = scmp.ge.s32.totalorder %s921_s14, 1  ;;  %s921_s14 = sphi %s956_s14, %s13_s14   ;;  %s917_s13 = sphi %s954_s13, %s1087_s13   ;;  %s913_s12 = sphi %s952_s12, %s1086_s12  }
   0x3   : > { %p34_p1 = scmp.ge.s32.totalorder %s32_s15, 2  ;;  %p190_p2 = scmp.lt.s32.totalorder %s921_s14, 3 }
   0x5   : > { %s1089_s15 = smov (%p34_p1, %s32_s15), 0  ;;  %p191_p3 = pnand %p820_p0, %p190_p2 }
   0x6   : > { %p232_p4 = scmp.lt.s32.totalorder (!%p191_p3), %s913_s12, 1  ;;  %s924_s23 = smov (!%p191_p3), 112  }
   0x7   : > { %194 = sbr.rel (%p191_p3) target bundleno = 1141 (0x475), region = 32  ;;  %s925_s24 = smov (!%p191_p3), 120  }
   0x8   : > { %s926_s25 = smov (!%p191_p3), 104   ;;  %s929_s29 = smov (!%p191_p3), 8  }
   0x9   : > { %s930_s30 = smov (!%p191_p3), 16   ;;  %s931_s4 = smov (!%p191_p3), 24  }
   0xc   : > { %s1091_s12 = smov (!%p232_p4, %s913_s12), 1  ;;  %vm279_vm0 = vcmask 64512   ;;  %vm264_vm1 = vcmask 7168   ;;  %v923_v3 = vmov -inf   ;;  %v927_v6 = vmov 0  }
   0xd   : > { %s970_s16 = sshll.u32 %s1091_s12, 3  ;;  %265 = vst.msk [vmem:[#allocation2] sm:$0xff] %vm264_vm1, %v923_v3  ;;  %872 = vset.pattern.permute.xlu1 %v927_v6  ;;  %873 = vset.pattern.permute.xlu2 %v927_v6  ;;  %v928_v7 = vmov 0.0   ;;  %vm273_vm2 = vcmask 261120   ;;  %vm461_vm3 = vcmask 130112   ;;  %vm562_vm4 = vcmask 195712  }
   0xe   : > { %s245_s19 = scalar_lea.vmem %s1083_s1, %s970_s16  ;;  %s238_s22 = scalar_lea.vmem %s1082_s0, %s970_s16  ;;  %266 = vst.msk [vmem:[#allocation2 + $0x8] sm:$0xff] %vm264_vm1, %v923_v3  ;;  %874 = vset.pattern.permute.xlu0 %v927_v6  ;;  %vm663_vm5 = vcmask 261312  }
   0xf   : > { %v277_v0 = vld [vmem:[%s245_s19] sm:$0xff]  ;;  %267 = vst.msk [vmem:[#allocation2 + $0x10] sm:$0xff] %vm264_vm1, %v923_v3  ;;  %s252_s28 = scalar_lea.vmem %s1084_s2, %s970_s16  ;;  %s259_s7 = scalar_lea.vmem %s1085_s3, %s970_s16 }
  0x10   : > { %v275_v1 = vld [vmem:[%s238_s22] sm:$0xff]  ;;  %825 = vmatpush.xpose.msk.msra.mxu0 %vm279_vm0, %v277_v0  ;;  %268 = vst.msk [vmem:[#allocation2 + $0x18] sm:$0xff] %vm264_vm1, %v923_v3  ;;  %472 = vrot.lane.b32.xlu2 %v277_v0, %s924_s23 }
  0x11   : > { %v276_v2 = vmul.f32 0.35355338, %v275_v1  ;;  %269 = vst.msk [vmem:[#allocation3] sm:$0xff] %vm264_vm1, %v928_v7  ;;  %v278_v13 = vld [vmem:[%s252_s28] sm:$0xff] }
  0x12   : > { %270 = vst.msk [vmem:[#allocation3 + $0x8] sm:$0xff] %vm264_vm1, %v928_v7  ;;  %355 = vmatpush.msra.mxu1 %v278_v13 }
  0x13   : > { %826 = vmatmul.msk.f32.vlgmr.msra.gmra.mxu0 %vm279_vm0, %v276_v2  ;;  %271 = vst.msk [vmem:[#allocation3 + $0x10] sm:$0xff] %vm264_vm1, %v928_v7 }
  0x14   : > { %272 = vst.msk [vmem:[#allocation3 + $0x18] sm:$0xff] %vm264_vm1, %v928_v7  ;;  %v306_v8 = vld [vmem:[#allocation2] sm:$0xff] }
  0x15   : > { %v398_v30 = vld [vmem:[#allocation2 + $0x8] sm:$0xff]  ;;  %274 = vst.msk [vmem:[#allocation4] sm:$0xff] %vm273_vm2, %v928_v7 }
  0x16   : > { %v499_v33 = vld [vmem:[#allocation2 + $0x10] sm:$0xff] }
  0x17   : > { %v1026_v34 = vld [vmem:[#allocation2 + $0x18] sm:$0xff] }
  0x18   : > { %469 = vrot.lane.b32.xlu2 %v276_v2, %s924_s23  ;;  %v322_v6 = vld [vmem:[#allocation3] sm:$0xff] }
  0x1c   : > { %v330_v57 = vld [vmem:[#allocation4] sm:$0xff] }
  0x20   : > { %570 = vrot.lane.b32.xlu2 %v276_v2, %s926_s25 }
  0x6a   : > { %v473_v14 = vpop.permute.xlu2 %472 }
  0x6b   : > { %831 = vmatpush.xpose.msk.msrb.mxu1 %vm279_vm0, %v473_v14 }
  0x72   : > { %v470_v18 = vpop.permute.xlu2 %469 }
  0x7a   : > { %v571_v22 = vpop.permute.xlu2 %570 }
  0x90   : > { %v303_v4 = vpop.f32.mrf.mxu0 }
  0x91   : > { %v307_v5 = vsel %vm279_vm0, %v303_v4, -inf }
  0x92   : > { %308 = vmax.xlane.f32.xlu0 %v307_v5 }
  0xa6   : > { %371 = vrot.lane.b32.xlu0 %v277_v0, %s925_s24 }
 0x105   : > { %v309_v9 = vpop.xlane.xlu0 %308 }
 0x106   : > { %v310_v10 = vmax.f32 %v306_v8, %v309_v9 }
 0x108   : > { %v311_v11 = vsub.f32 %v306_v8, %v310_v10  ;;  %362 = vst.msk [vmem:[#allocation2] sm:$0xff] %vm264_vm1, %v310_v10  ;;  %316 = vperm.xlu1 %872, %v310_v10   ;;  %v415_v10 = vld [vmem:[#allocation3 + $0x8] sm:$0xff] }
 0x10a   : > { %v312_v40 = vmul.f32 1.442695, %v311_v11 }
 0x110   : > { %368 = vrot.lane.b32.xlu1 %v276_v2, %s925_s24 }
 0x118   : > { %573 = vrot.lane.b32.xlu1 %v277_v0, %s926_s25  ;;  %v372_v12 = vpop.permute.xlu0 %371 }
 0x119   : > { %828 = vmatpush.xpose.msk.msra.mxu2 %vm279_vm0, %v372_v12 }
 0x17a   : > { %v317_v15 = vpop.permute.xlu1 %316 }
 0x17b   : > { %v319_v16 = vsub.f32 %v303_v4, %v317_v15 }
 0x17d   : > { %v320_v17 = vmul.f32 1.442695, %v319_v16 }
 0x17f   : > { %875 = vpow2.f32 %v320_v17 }
 0x180   : > { %877 = vpow2.f32 %v312_v40  ;;  %v516_v40 = vld [vmem:[#allocation3 + $0x10] sm:$0xff] }
 0x182   : > { %v369_v19 = vpop.permute.xlu1 %368 }
 0x183   : > { %829 = vmatmul.msk.f32.vlgmr.msra.gmra.mxu2 %vm279_vm0, %v369_v19 }
 0x185   : > { %v876_v20 = vpop.eup %875 }
 0x186   : > { %827 = vmatmul.msk.f32.vlgmr.msra.gmra.mxu1 %vm279_vm0, %v876_v20  ;;  %v878_v43 = vpop.eup %877  ;;  %v324_v45 = vsel %vm279_vm0, %v876_v20, 0.0 }
 0x187   : > { %v323_v7 = vmul.f32 %v878_v43, %v322_v6 }
 0x18a   : > { %v574_v21 = vpop.permute.xlu1 %573 }
 0x18b   : > { %834 = vmatpush.xpose.msk.msrb.mxu0 %vm279_vm0, %v574_v21 }
 0x18e   : > { %832 = vmatmul.msk.f32.vlgmr.msrb.gmra.mxu1 %vm279_vm0, %v470_v18  ;;  %835 = vmatmul.msk.f32.vlgmr.msrb.gmra.mxu0 %vm279_vm0, %v571_v22  ;;  %v617_v18 = vld [vmem:[#allocation3 + $0x18] sm:$0xff] }
 0x203   : > { %v1013_v23 = vpop.f32.mrf.mxu1 }
 0x206   : > { %v394_v24 = vpop.f32.mrf.mxu2 }
 0x207   : > { %v399_v25 = vsel %vm279_vm0, %v394_v24, -inf }
 0x208   : > { %400 = vmax.xlane.f32.xlu1 %v399_v25 }
 0x20b   : > { %v1016_v26 = vpop.f32.mrf.mxu1  ;;  %v1018_v27 = vpop.f32.mrf.mxu0 }
 0x20c   : > { %v500_v28 = vsel %vm279_vm0, %v1016_v26, -inf  ;;  %v601_v29 = vsel %vm279_vm0, %v1018_v27, -inf }
 0x20d   : > { %501 = vmax.xlane.f32.xlu2 %v500_v28  ;;  %602 = vmax.xlane.f32.xlu0 %v601_v29 }
 0x221   : > { %430 = vrot.lane.b32.xlu1 %v278_v13, %s925_s24 }
 0x27b   : > { %v401_v31 = vpop.xlane.xlu1 %400 }
 0x27c   : > { %v402_v32 = vmax.f32 %v398_v30, %v401_v31 }
 0x27e   : > { %463 = vst.msk [vmem:[#allocation2 + $0x8] sm:$0xff] %vm264_vm1, %v402_v32  ;;  %408 = vperm.xlu2 %873, %v402_v32   ;;  %v403_v41 = vsub.f32 %v398_v30, %v402_v32 }
 0x280   : > { %v502_v35 = vpop.xlane.xlu2 %501  ;;  %v603_v36 = vpop.xlane.xlu0 %602  ;;  %v404_v42 = vmul.f32 1.442695, %v403_v41 }
 0x281   : > { %v503_v37 = vmax.f32 %v499_v33, %v502_v35  ;;  %v1029_v38 = vmax.f32 %v1026_v34, %v603_v36 }
 0x282   : > { %879 = vpow2.f32 %v404_v42 }
 0x283   : > { %564 = vst.msk [vmem:[#allocation2 + $0x10] sm:$0xff] %vm264_vm1, %v503_v37  ;;  %v605_v39 = vsub.f32 %v1026_v34, %v1029_v38  ;;  %509 = vperm.xlu0 %874, %v503_v37   ;;  %610 = vperm.xlu1 %872, %v1029_v38   ;;  %v504_v46 = vsub.f32 %v499_v33, %v503_v37 }
 0x284   : > { %665 = vst.msk [vmem:[#allocation2 + $0x18] sm:$0xff] %vm264_vm1, %v1029_v38 }
 0x285   : > { %v505_v47 = vmul.f32 1.442695, %v504_v46  ;;  %v606_v14 = vmul.f32 1.442695, %v605_v39 }
 0x286   : > { %531 = vrot.lane.b32.xlu2 %v278_v13, %s924_s23 }
 0x287   : > { %881 = vpow2.f32 %v505_v47 }
 0x288   : > { %v880_v44 = vpop.eup %879 }
 0x289   : > { %v416_v11 = vmul.f32 %v880_v44, %v415_v10 }
 0x28d   : > { %v1040_v49 = vpop.eup %881 }
 0x28e   : > { %632 = vrot.lane.b32.xlu2 %v278_v13, %s926_s25  ;;  %v517_v41 = vmul.f32 %v1040_v49, %v516_v40 }
 0x293   : > { %v431_v48 = vpop.permute.xlu1 %430 }
 0x294   : > { %451 = vmatpush.msra.mxu3 %v431_v48 }
 0x296   : > { %333 = vperm.xlu2 %873, %v878_v43  }
 0x29e   : > { %425 = vperm.xlu2 %873, %v880_v44  }
 0x2ad   : > { %325 = vadd.xlane.f32.xlu1 %v324_v45 }
 0x2c6   : > { %526 = vperm.xlu1 %872, %v1040_v49  }
 0x2d8   : > { %v409_v50 = vpop.permute.xlu2 %408 }
 0x2d9   : > { %v411_v51 = vsub.f32 %v394_v24, %v409_v50 }
 0x2db   : > { %v412_v52 = vmul.f32 1.442695, %v411_v51 }
 0x2dd   : > { %883 = vpow2.f32 %v412_v52 }
 0x2e0   : > { %v532_v53 = vpop.permute.xlu2 %531 }
 0x2e1   : > { %552 = vmatpush.msrb.mxu3 %v532_v53 }
 0x2e3   : > { %v884_v54 = vpop.eup %883 }
 0x2e4   : > { %830 = vmatmul.msk.f32.vlgmr.msra.gmra.mxu3 %vm279_vm0, %v884_v54  ;;  %v417_v55 = vsel %vm279_vm0, %v884_v54, 0.0 }
 0x2e5   : > { %418 = vadd.xlane.f32.xlu0 %v417_v55 }
 0x2e8   : > { %v633_v56 = vpop.permute.xlu2 %632 }
 0x2e9   : > { %653 = vmatpush.msrb.mxu2 %v633_v56 }
 0x2f0   : > { %v334_v58 = vpop.permute.xlu2 %333 }
 0x2f1   : > { %v336_v59 = vmul.f32 %v334_v58, %v330_v57 }
 0x2f3   : > { %v360_v60 = vadd.f32 %v1013_v23, %v336_v59 }
 0x2f5   : > { %361 = vst.msk [vmem:[#allocation4] sm:$0xff] %vm279_vm0, %v360_v60  ;;  %v611_v61 = vpop.permute.xlu1 %610  ;;  %v510_v62 = vpop.permute.xlu0 %509 }
 0x2f6   : > { %v613_v63 = vsub.f32 %v1018_v27, %v611_v61  ;;  %v512_v0 = vsub.f32 %v1016_v26, %v510_v62 }
 0x2f8   : > { %v614_v1 = vmul.f32 1.442695, %v613_v63  ;;  %v513_v2 = vmul.f32 1.442695, %v512_v0  ;;  %v426_v31 = vpop.permute.xlu2 %425 }
 0x2fa   : > { %885 = vpow2.f32 %v614_v1 }
 0x2fb   : > { %887 = vpow2.f32 %v513_v2 }
 0x2fc   : > { %889 = vpow2.f32 %v606_v14  ;;  %v422_v32 = vld [vmem:[#allocation4] sm:$0xff] }
 0x2fd   : > { %v428_v33 = vmul.f32 %v426_v31, %v422_v32 }
 0x300   : > { %v886_v3 = vpop.eup %885 }
 0x301   : > { %v888_v4 = vpop.eup %887  ;;  %836 = vmatmul.msk.f32.vlgmr.msrb.gmra.mxu2 %vm279_vm0, %v886_v3  ;;  %v619_v5 = vsel %vm279_vm0, %v886_v3, 0.0 }
 0x302   : > { %833 = vmatmul.msk.f32.vlgmr.msrb.gmra.mxu3 %vm279_vm0, %v888_v4  ;;  %620 = vadd.xlane.f32.xlu1 %v619_v5  ;;  %v890_v17 = vpop.eup %889  ;;  %v518_v25 = vsel %vm279_vm0, %v888_v4, 0.0 }
 0x303   : > { %v618_v19 = vmul.f32 %v890_v17, %v617_v18 }
 0x320   : > { %v326_v8 = vpop.xlane.xlu1 %325 }
 0x321   : > { %v327_v9 = vadd.f32 %v326_v8, %v323_v7 }
 0x323   : > { %329 = vst.msk [vmem:[#allocation3] sm:$0xff] %vm264_vm1, %v327_v9 }
 0x32a   : > { %v669_v23 = vld [vmem:[#allocation3] sm:$0xff] }
 0x32b   : > { %891 = vrcp.f32 %v669_v23 }
 0x331   : > { %v892_v27 = vpop.eup %891 }
 0x338   : > { %v527_v16 = vpop.permute.xlu1 %526 }
 0x358   : > { %v419_v12 = vpop.xlane.xlu0 %418 }
 0x359   : > { %v420_v13 = vadd.f32 %v419_v12, %v416_v11 }
 0x35b   : > { %421 = vst.msk [vmem:[#allocation3 + $0x8] sm:$0xff] %vm264_vm1, %v420_v13 }
 0x362   : > { %v679_v26 = vld [vmem:[#allocation3 + $0x8] sm:$0xff] }
 0x363   : > { %893 = vrcp.f32 %v679_v26 }
 0x367   : > { %v453_v15 = vpop.f32.mrf.mxu3 }
 0x368   : > { %457 = vrot.lane.b32.xlu2 %v453_v15, %s929_s29 }
 0x369   : > { %v894_v29 = vpop.eup %893 }
 0x375   : > { %v621_v20 = vpop.xlane.xlu1 %620 }
 0x376   : > { %v622_v21 = vadd.f32 %v621_v20, %v618_v19 }
 0x378   : > { %623 = vst.msk [vmem:[#allocation3 + $0x18] sm:$0xff] %vm264_vm1, %v622_v21 }
 0x37f   : > { %v699_v28 = vld [vmem:[#allocation3 + $0x18] sm:$0xff] }
 0x380   : > { %895 = vrcp.f32 %v699_v28 }
 0x384   : > { %v655_v24 = vpop.f32.mrf.mxu2 }
 0x385   : > { %v554_v22 = vpop.f32.mrf.mxu3 }
 0x386   : > { %558 = vrot.lane.b32.xlu0 %v554_v22, %s930_s30  ;;  %v896_v30 = vpop.eup %895 }
 0x38e   : > { %659 = vrot.lane.b32.xlu0 %v655_v24, %s931_s4 }
 0x391   : > { %519 = vadd.xlane.f32.xlu2 %v518_v25 }
 0x396   : > { %674 = vperm.xlu0 %874, %v892_v27  }
 0x39e   : > { %684 = vperm.xlu0 %874, %v894_v29  }
 0x3a6   : > { %704 = vperm.xlu0 %874, %v896_v30  }
 0x3a9   : > { %627 = vperm.xlu2 %873, %v890_v17  }
 0x3c2   : > { %v458_v34 = vpop.permute.xlu2 %457 }
 0x3c3   : > { %v460_v35 = vadd.f32 %v458_v34, %v428_v33 }
 0x3c5   : > { %462 = vst.msk [vmem:[#allocation4] sm:$0xff] %vm461_vm3, %v460_v35 }
 0x3cc   : > { %v523_v36 = vld [vmem:[#allocation4] sm:$0xff] }
 0x3cd   : > { %v529_v37 = vmul.f32 %v527_v16, %v523_v36 }
 0x3f8   : > { %v559_v38 = vpop.permute.xlu0 %558 }
 0x3f9   : > { %v561_v39 = vadd.f32 %v559_v38, %v529_v37 }
 0x3fb   : > { %563 = vst.msk [vmem:[#allocation4] sm:$0xff] %vm562_vm4, %v561_v39 }
 0x400   : > { %v660_v42 = vpop.permute.xlu0 %659 }
 0x402   : > { %v624_v46 = vld [vmem:[#allocation4] sm:$0xff] }
 0x404   : > { %v520_v43 = vpop.xlane.xlu2 %519 }
 0x405   : > { %v521_v44 = vadd.f32 %v520_v43, %v517_v41 }
 0x407   : > { %522 = vst.msk [vmem:[#allocation3 + $0x10] sm:$0xff] %vm264_vm1, %v521_v44 }
 0x408   : > { %v675_v48 = vpop.permute.xlu0 %674 }
 0x40c   : > { %v628_v45 = vpop.permute.xlu2 %627 }
 0x40d   : > { %v630_v47 = vmul.f32 %v628_v45, %v624_v46 }
 0x40e   : > { %v689_v50 = vld [vmem:[#allocation3 + $0x10] sm:$0xff] }
 0x40f   : > { %v662_v51 = vadd.f32 %v660_v42, %v630_v47  ;;  %897 = vrcp.f32 %v689_v50 }
 0x410   : > { %v685_v53 = vpop.permute.xlu0 %684 }
 0x411   : > { %664 = vst.msk [vmem:[#allocation4] sm:$0xff] %vm663_vm5, %v662_v51 }
 0x415   : > { %v898_v52 = vpop.eup %897 }
 0x416   : > { %694 = vperm.xlu2 %873, %v898_v52  }
 0x418   : > { %v671_v49 = vld [vmem:[#allocation4] sm:$0xff]  ;;  %v705_v56 = vpop.permute.xlu0 %704 }
 0x419   : > { %v677_v54 = vmul.f32 %v675_v48, %v671_v49  ;;  %v687_v55 = vmul.f32 %v685_v53, %v671_v49  ;;  %v707_v59 = vmul.f32 %v705_v56, %v671_v49 }
 0x41b   : > { %678 = vst.msk [vmem:[%s259_s7] sm:$0xff] %vm279_vm0, %v677_v54 }
 0x41c   : > { %688 = vst.msk [vmem:[%s259_s7] sm:$0xff] %vm461_vm3, %v687_v55 }
 0x470   : > { %v695_v57 = vpop.permute.xlu2 %694 }
 0x471   : > { %v697_v58 = vmul.f32 %v695_v57, %v671_v49 }
 0x473   : > { %698 = vst.msk [vmem:[%s259_s7] sm:$0xff] %vm562_vm4, %v697_v58 }
 0x474   : > { %708 = vst.msk [vmem:[%s259_s7] sm:$0xff] %vm663_vm5, %v707_v59 }
 0x475 PF: > { %s13_s14 = sadd.s32 1, %s921_s14   ;;  %s1086_s12 = smov %s917_s13 }
 0x476   : > { %p10_p5 = scmp.ge.s32.totalorder %s13_s14, 4   ;;  %s1087_s13 = smov %s1089_s15 }
 0x478   :  { %12 = sbr.rel (!%p10_p5) target bundleno = 2 (0x2), region = 82 }

</bundles_post_ra>
